<compile_context>
chip_gen: v6e
topology: v6e:2x2x1
jax: 0.10.0
libtpu: 0.0.40
codegen_flags: <defaults>
</compile_context>

<pallas_src>
import functools

import jax
import jax.numpy as jnp
from jax import lax
from jax.experimental import pallas as pl
from jax.experimental.pallas import tpu as pltpu


# ------------------------------ fused kernel --------------------------------

def _make_bottleneck_kernel(*, first_block, has_ds_conv, stride, H, W, Cin,
                            width, cout, compute_dtype, scratch_dtype, lpad):
    s = stride
    Ho = (H - 1) // s + 1
    Wo = (W - 1) // s + 1
    Hp = H + 2
    Wpad = lpad + W + 1

    def hslice(kh):
        # strided ref read along the (leading) H axis
        return pl.ds(kh, Ho) if s == 1 else pl.ds(kh, Ho, s)

    def wslice(kw):
        # strided ref read along the (sublane) W axis; conv left pad sits at
        # column lpad-1 so reads start at lpad-1+kw.
        start = lpad - 1 + kw
        return pl.ds(start, Wo) if s == 1 else pl.ds(start, Wo, s)

    def kernel(*refs):
        it = iter(refs)
        x_ref = next(it)                              # (H, W, Cin)       f32
        if not first_block:
            s0_ref, b0_ref = next(it), next(it)       # (1, Cin)          f32
        w1_ref, b1_ref = next(it), next(it)           # (Cin, width) bf16 / (1, width) f32
        w2_ref, b2_ref = next(it), next(it)           # (9*width, width) bf16 / (1, width)
        w3_ref, b3_ref = next(it), next(it)           # (width, cout) bf16 / (1, cout)
        if has_ds_conv:
            wd_ref, bd_ref = next(it), next(it)       # (Cin, cout) bf16 / (1, cout)
        out_ref = next(it)                            # (Ho*Wo, cout)     f32
        out1p_ref = next(it)                          # (Hp, Wpad, width) scratch_dtype
        panel_ref = next(it)                          # (Ho, Wo, 9*width) compute_dtype

        xv = x_ref[...]                               # (H, W, Cin)
        x2d = xv.reshape(H * W, Cin)

        # ---- bn0 + QuantReLU (identity when first_block) ----
        if first_block:
            out0 = x2d
        else:
            out0 = jnp.maximum(x2d * s0_ref[...] + b0_ref[...], 0.0)

        # ---- conv1 (1x1); BN1 scale pre-folded into the weight columns ----
        a1 = jnp.dot(out0.astype(compute_dtype), w1_ref[...],
                     preferred_element_type=jnp.float32)
        out1 = jnp.maximum(a1 + b1_ref[...], 0.0)     # (H*W, width) f32

        # ---- zero only the border strips (every step: megacore-safe, and
        #      much cheaper than a full-scratch memset) ----
        zrow = jnp.zeros((Wpad, width), scratch_dtype)
        out1p_ref[0] = zrow                           # top pad row
        out1p_ref[H + 1] = zrow                       # bottom pad row
        zcol = jnp.zeros((Hp, 1, width), scratch_dtype)
        out1p_ref[:, lpad - 1:lpad, :] = zcol         # left conv pad column
        out1p_ref[:, lpad + W:lpad + W + 1, :] = zcol  # right conv pad column

        # ---- interior store, sublane-aligned at offset `lpad` ----
        out1p_ref[1:H + 1, lpad:lpad + W, :] = (
            out1.reshape(H, W, width).astype(scratch_dtype))

        # ---- conv2 (3x3, stride, pad=1) as ONE big-K matmul:
        #      build the im2col panel with strided ref reads (exactly Ho x Wo
        #      rows/cols per tap), then a single MXU dot with K = 9*width. ----
        for kh in range(3):
            for kw in range(3):
                tap = kh * 3 + kw
                v = out1p_ref[hslice(kh), wslice(kw), :]    # (Ho, Wo, width)
                panel_ref[:, :, tap * width:(tap + 1) * width] = (
                    v.astype(compute_dtype))
        a2 = jnp.dot(panel_ref[...].reshape(Ho * Wo, 9 * width), w2_ref[...],
                     preferred_element_type=jnp.float32)
        out2 = jnp.maximum(a2 + b2_ref[...], 0.0)     # (Ho*Wo, width)

        # ---- conv3 (1x1) + bias + ReLU, staged through out_ref to cut the
        #      number of simultaneously-live f32 slabs in the epilogue ----
        a3 = jnp.dot(out2.astype(compute_dtype), w3_ref[...],
                     preferred_element_type=jnp.float32)
        out_ref[...] = jnp.maximum(a3 + b3_ref[...], 0.0).astype(out_ref.dtype)

        # ---- residual branch, fully fused ----
        if has_ds_conv:
            if s == 1:
                xd2d = x2d                            # (H*W, Cin)
            else:
                xd = x_ref[pl.ds(0, Ho, s), pl.ds(0, Wo, s), :]  # strided read
                xd2d = xd.reshape(Ho * Wo, Cin)
            ad = jnp.dot(xd2d.astype(compute_dtype), wd_ref[...],
                         preferred_element_type=jnp.float32)
            res = jnp.maximum(ad + bd_ref[...], 0.0)
        else:
            res = jnp.maximum(x2d, 0.0)               # identity QuantReLU on x

        # ---- add + relu_out (read-modify-write of the resident out block) ----
        out_ref[...] = jnp.maximum(out_ref[...] + res, 0.0).astype(out_ref.dtype)

    return kernel


def fold_bn(gamma, beta, mean, var, eps=1e-5):
    scale = gamma / jnp.sqrt(var + eps)
    bias = beta - mean * scale
    return scale, bias


def _vmem_limit_bytes():
    """~half of physical VMEM: 64 MiB on v5e/v6e (128 MiB), 32 MiB on v7x."""
    try:
        cap = int(pltpu.get_tpu_info().vmem_capacity_bytes)
        return min(cap // 2, 96 * 1024 * 1024)
    except Exception:
        return 32 * 1024 * 1024


@functools.partial(jax.jit,
                   static_argnames=("first_block", "stride", "compute_dtype"))
def bottleneck_forward(x_nchw, params, *, first_block, stride,
                       compute_dtype=jnp.bfloat16):
    """Fused Pallas forward of the Bottleneck block.  NCHW in, NCHW out."""
    x = jnp.transpose(x_nchw, (0, 2, 3, 1)).astype(jnp.float32)      # NHWC
    N, H, W, Cin = x.shape
    width = params["conv1_w"].shape[0]
    cout = params["conv3_w"].shape[0]
    s = stride
    assert H % s == 0 and W % s == 0, "spatial dims must be divisible by stride"
    Ho = (H - 1) // s + 1
    Wo = (W - 1) // s + 1
    has_ds_conv = (s != 1) or (Cin != cout)

    # padded conv1 scratch dtype: bf16 (half the bytes) when no strided
    # sublane reads are needed; f32 for stride>1 (proven 32-bit strided path).
    scratch_dtype = compute_dtype if s == 1 else jnp.float32
    lpad = 16 if jnp.dtype(scratch_dtype).itemsize < 4 else 8

    # ---- fold BN scales into conv weights (per output channel), cast bf16 ----
    # TODO(synk): int8 weights on v5e/v6e (fp8 on v7x) would double MXU rate.
    s1, b1 = fold_bn(*params["bn1"])
    s2, b2 = fold_bn(*params["bn2"])
    s3, b3 = fold_bn(*params["bn3"])
    w1 = (params["conv1_w"][:, :, 0, 0].T * s1[None, :]).astype(compute_dtype)
    # (O, I, KH, KW) -> (KH, KW, I, O) -> (9*width, width), K-order = (tap, cin)
    w2 = jnp.transpose(params["conv2_w"], (2, 3, 1, 0)).reshape(9 * width, width)
    w2 = (w2 * s2[None, :]).astype(compute_dtype)
    w3 = (params["conv3_w"][:, :, 0, 0].T * s3[None, :]).astype(compute_dtype)

    def cvec(v, c):
        return v.reshape(1, c).astype(jnp.float32)

    def vec_spec(c):
        return pl.BlockSpec((1, c), lambda b: (0, 0))

    def full_spec(shape):
        n = len(shape)
        return pl.BlockSpec(shape, lambda b: (0,) * n)

    args = [x]
    in_specs = [pl.BlockSpec((None, H, W, Cin), lambda b: (b, 0, 0, 0))]
    if not first_block:
        s0, b0 = fold_bn(*params["bn0"])
        args += [cvec(s0, Cin), cvec(b0, Cin)]
        in_specs += [vec_spec(Cin), vec_spec(Cin)]
    args += [w1, cvec(b1, width), w2, cvec(b2, width), w3, cvec(b3, cout)]
    in_specs += [full_spec((Cin, width)), vec_spec(width),
                 full_spec((9 * width, width)), vec_spec(width),
                 full_spec((width, cout)), vec_spec(cout)]
    if has_ds_conv:
        sd, bd = fold_bn(*params["bnd"])
        wd = (params["convd_w"][:, :, 0, 0].T * sd[None, :]).astype(compute_dtype)
        args += [wd, cvec(bd, cout)]
        in_specs += [full_spec((Cin, cout)), vec_spec(cout)]

    kernel = _make_bottleneck_kernel(
        first_block=first_block, has_ds_conv=has_ds_conv, stride=s,
        H=H, W=W, Cin=Cin, width=width, cout=cout,
        compute_dtype=compute_dtype, scratch_dtype=scratch_dtype, lpad=lpad)

    out = pl.pallas_call(
        kernel,
        out_shape=jax.ShapeDtypeStruct((N, Ho * Wo, cout), jnp.float32),
        grid=(N,),
        in_specs=in_specs,
        out_specs=pl.BlockSpec((None, Ho * Wo, cout), lambda b: (b, 0, 0)),
        scratch_shapes=[
            pltpu.VMEM((H + 2, lpad + W + 1, width), scratch_dtype),  # padded conv1 out
            pltpu.VMEM((Ho, Wo, 9 * width), compute_dtype),           # im2col panel
        ],
        compiler_params=pltpu.CompilerParams(
            dimension_semantics=("parallel",),
            vmem_limit_bytes=_vmem_limit_bytes()),
    )(*args)

    out = out.reshape(N, Ho, Wo, cout)
    return jnp.transpose(out, (0, 3, 1, 2))                          # NCHW


# ---------------------------- pure-JAX reference -----------------------------

def bottleneck_ref(x_nchw, params, *, first_block, stride,
                   compute_dtype=jnp.bfloat16):
    """lax.conv reference using the same BN folding / bf16 cast points."""
    x = jnp.transpose(x_nchw, (0, 2, 3, 1)).astype(jnp.float32)

    def conv_bn_relu(y, w_oihw, bn, st, pad):
        sc, bi = fold_bn(*bn)
        w = jnp.transpose(w_oihw, (2, 3, 1, 0)) * sc[None, None, None, :]  # HWIO
        out = lax.conv_general_dilated(
            y.astype(compute_dtype), w.astype(compute_dtype),
            window_strides=(st, st), padding=((pad, pad), (pad, pad)),
            dimension_numbers=("NHWC", "HWIO", "NHWC"),
            preferred_element_type=jnp.float32)
        return jnp.maximum(out + bi[None, None, None, :], 0.0)

    out = x
    if not first_block:
        s0, b0 = fold_bn(*params["bn0"])
        out = jnp.maximum(out * s0 + b0, 0.0)
    out = conv_bn_relu(out, params["conv1_w"], params["bn1"], 1, 0)
    out = conv_bn_relu(out, params["conv2_w"], params["bn2"], stride, 1)
    out = conv_bn_relu(out, params["conv3_w"], params["bn3"], 1, 0)
    cin = x.shape[-1]
    cout = params["conv3_w"].shape[0]
    if stride != 1 or cin != cout:
        res = conv_bn_relu(x, params["convd_w"], params["bnd"], stride, 0)
    else:
        res = jnp.maximum(x, 0.0)
    out = jnp.maximum(out + res, 0.0)
    return jnp.transpose(out, (0, 3, 1, 2))


# ------------------------------------ main -----------------------------------

if __name__ == "__main__":
    key = jax.random.PRNGKey(0)

    def bn_params(k, c):
        k1, k2, k3, k4 = jax.random.split(k, 4)
        return (1.0 + 0.1 * jax.random.normal(k1, (c,), jnp.float32),
                0.1 * jax.random.normal(k2, (c,), jnp.float32),
                0.1 * jax.random.normal(k3, (c,), jnp.float32),
                jnp.abs(jax.random.normal(k4, (c,), jnp.float32)) + 0.5)

    def make_params(k, inplanes, planes):
        width = planes            # base_width=64, groups=1 -> width == planes
        cout = planes * 4
        ks = jax.random.split(k, 9)
        return {
            "bn0": bn_params(ks[0], inplanes),
            "conv1_w": 0.1 * jax.random.normal(ks[1], (width, inplanes, 1, 1), jnp.float32),
            "bn1": bn_params(ks[2], width),
            "conv2_w": 0.1 * jax.random.normal(ks[3], (width, width, 3, 3), jnp.float32),
            "bn2": bn_params(ks[4], width),
            "conv3_w": 0.1 * jax.random.normal(ks[5], (cout, width, 1, 1), jnp.float32),
            "bn3": bn_params(ks[6], cout),
            "convd_w": 0.1 * jax.random.normal(ks[7], (cout, inplanes, 1, 1), jnp.float32),
            "bnd": bn_params(ks[8], cout),
        }

    batch, hw = 2, 16
    configs = [
        # (inplanes, planes, first_block, stride)
        (16, 4, False, 2),   # bn0 active, stride-2 conv downsample branch
        (16, 4, False, 1),   # bn0 active, identity (QuantReLU) residual
        (8,  4, True,  1),   # first block: no bn0, channel-expanding conv downsample
    ]
    for i, (inplanes, planes, first_block, stride) in enumerate(configs):
        kp, kx = jax.random.split(jax.random.fold_in(key, i))
        params = make_params(kp, inplanes, planes)
        x = jax.random.normal(kx, (batch, inplanes, hw, hw), jnp.float32)  # NCHW

        out = jax.block_until_ready(
            bottleneck_forward(x, params, first_block=first_block, stride=stride))
        ref = jax.block_until_ready(
            bottleneck_ref(x, params, first_block=first_block, stride=stride))

        cout = 4 * planes
        assert out.shape == (batch, cout, hw // stride, hw // stride), out.shape
        err = float(jnp.max(jnp.abs(out - ref)))
        assert err < 2e-2, (i, err)

    print("KERNEL_OK")
</pallas_src>

<mosaic_0001>
module attributes {stable_mosaic.version = 11 : i64} {
  func.func @kernel(%arg0: i32, %arg1: memref<1x16x16x16xf32, #tpu.memory_space<vmem>>, %arg2: memref<1x16xf32, #tpu.memory_space<vmem>>, %arg3: memref<1x16xf32, #tpu.memory_space<vmem>>, %arg4: memref<16x4xbf16, #tpu.memory_space<vmem>>, %arg5: memref<1x4xf32, #tpu.memory_space<vmem>>, %arg6: memref<36x4xbf16, #tpu.memory_space<vmem>>, %arg7: memref<1x4xf32, #tpu.memory_space<vmem>>, %arg8: memref<4x16xbf16, #tpu.memory_space<vmem>>, %arg9: memref<1x16xf32, #tpu.memory_space<vmem>>, %arg10: memref<16x16xbf16, #tpu.memory_space<vmem>>, %arg11: memref<1x16xf32, #tpu.memory_space<vmem>>, %arg12: memref<1x64x16xf32, #tpu.memory_space<vmem>>, %arg13: memref<18x25x4xf32, #tpu.memory_space<vmem>>, %arg14: memref<8x8x36xbf16, #tpu.memory_space<vmem>>) attributes {dimension_semantics = [#tpu.dimension_semantics<parallel>], iteration_bounds = array<i64: 2>, scalar_prefetch = 0 : i64, scratch_operands = 2 : i64, tpu.core_type = #tpu.core_type<tc>, window_params = [{transform_indices = @transform_0, window_bounds = array<i64: 1, 16, 16, 16>}, {pipeline_mode = #tpu.pipeline_mode<synchronous>, transform_indices = @transform_1, window_bounds = array<i64: 1, 16>}, {pipeline_mode = #tpu.pipeline_mode<synchronous>, transform_indices = @transform_2, window_bounds = array<i64: 1, 16>}, {pipeline_mode = #tpu.pipeline_mode<synchronous>, transform_indices = @transform_3, window_bounds = array<i64: 16, 4>}, {pipeline_mode = #tpu.pipeline_mode<synchronous>, transform_indices = @transform_4, window_bounds = array<i64: 1, 4>}, {pipeline_mode = #tpu.pipeline_mode<synchronous>, transform_indices = @transform_5, window_bounds = array<i64: 36, 4>}, {pipeline_mode = #tpu.pipeline_mode<synchronous>, transform_indices = @transform_6, window_bounds = array<i64: 1, 4>}, {pipeline_mode = #tpu.pipeline_mode<synchronous>, transform_indices = @transform_7, window_bounds = array<i64: 4, 16>}, {pipeline_mode = #tpu.pipeline_mode<synchronous>, transform_indices = @transform_8, window_bounds = array<i64: 1, 16>}, {pipeline_mode = #tpu.pipeline_mode<synchronous>, transform_indices = @transform_9, window_bounds = array<i64: 16, 16>}, {pipeline_mode = #tpu.pipeline_mode<synchronous>, transform_indices = @transform_10, window_bounds = array<i64: 1, 16>}, {transform_indices = @transform_11, window_bounds = array<i64: 1, 64, 16>}]} {
    %c0 = arith.constant 0 : index
    %c0_0 = arith.constant 0 : index
    %c0_1 = arith.constant 0 : index
    %c0_2 = arith.constant 0 : index
    %0 = vector.load %arg1[%c0, %c0_0, %c0_1, %c0_2] : memref<1x16x16x16xf32, #tpu.memory_space<vmem>>, vector<1x16x16x16xf32>
    %1 = vector.shape_cast %0 : vector<1x16x16x16xf32> to vector<16x16x16xf32>
    %2 = vector.shape_cast %1 : vector<16x16x16xf32> to vector<256x16xf32>
    %c0_3 = arith.constant 0 : index
    %c0_4 = arith.constant 0 : index
    %3 = vector.load %arg2[%c0_3, %c0_4] : memref<1x16xf32, #tpu.memory_space<vmem>>, vector<1x16xf32>
    %4 = vector.broadcast %3 : vector<1x16xf32> to vector<256x16xf32>
    %5 = arith.mulf %2, %4 : vector<256x16xf32>
    %c0_5 = arith.constant 0 : index
    %c0_6 = arith.constant 0 : index
    %6 = vector.load %arg3[%c0_5, %c0_6] : memref<1x16xf32, #tpu.memory_space<vmem>>, vector<1x16xf32>
    %7 = vector.broadcast %6 : vector<1x16xf32> to vector<256x16xf32>
    %8 = arith.addf %5, %7 : vector<256x16xf32>
    %cst = arith.constant 0.000000e+00 : f32
    %9 = vector.broadcast %cst : f32 to vector<256x16xf32>
    %10 = arith.maximumf %8, %9 : vector<256x16xf32>
    %11 = arith.truncf %10 : vector<256x16xf32> to vector<256x16xbf16>
    %c0_7 = arith.constant 0 : index
    %c0_8 = arith.constant 0 : index
    %12 = vector.load %arg4[%c0_7, %c0_8] : memref<16x4xbf16, #tpu.memory_space<vmem>>, vector<16x4xbf16>
    %cst_9 = arith.constant dense<0.000000e+00> : vector<256x4xf32>
    %13 = tpu.matmul %11, %12, %cst_9 {dimension_numbers = #tpu.dot_dimension_numbers<[1], [0], [0], [1], [0, 0, 1, 1], [], []>} : vector<256x16xbf16>, vector<16x4xbf16>, vector<256x4xf32> -> vector<256x4xf32>
    %c0_10 = arith.constant 0 : index
    %c0_11 = arith.constant 0 : index
    %14 = vector.load %arg5[%c0_10, %c0_11] : memref<1x4xf32, #tpu.memory_space<vmem>>, vector<1x4xf32>
    %15 = vector.broadcast %14 : vector<1x4xf32> to vector<256x4xf32>
    %16 = arith.addf %13, %15 : vector<256x4xf32>
    %cst_12 = arith.constant 0.000000e+00 : f32
    %17 = vector.broadcast %cst_12 : f32 to vector<256x4xf32>
    %18 = arith.maximumf %16, %17 : vector<256x4xf32>
    %cst_13 = arith.constant 0.000000e+00 : f32
    %19 = vector.broadcast %cst_13 : f32 to vector<25x4xf32>
    %c0_14 = arith.constant 0 : index
    %c0_15 = arith.constant 0 : index
    %c0_16 = arith.constant 0 : index
    %20 = vector.load %arg13[%c0_14, %c0_15, %c0_16] : memref<18x25x4xf32, #tpu.memory_space<vmem>>, vector<1x25x4xf32>
    %21 = vector.shape_cast %20 : vector<1x25x4xf32> to vector<25x4xf32>
    %22 = vector.shape_cast %19 : vector<25x4xf32> to vector<1x25x4xf32>
    tpu.vector_store %arg13[%c0_14, %c0_15, %c0_16], %22 {strides = array<i32>} : memref<18x25x4xf32, #tpu.memory_space<vmem>>, vector<1x25x4xf32>,
    %c17 = arith.constant 17 : index
    %c0_17 = arith.constant 0 : index
    %c0_18 = arith.constant 0 : index
    %23 = vector.load %arg13[%c17, %c0_17, %c0_18] : memref<18x25x4xf32, #tpu.memory_space<vmem>>, vector<1x25x4xf32>
    %24 = vector.shape_cast %23 : vector<1x25x4xf32> to vector<25x4xf32>
    %25 = vector.shape_cast %19 : vector<25x4xf32> to vector<1x25x4xf32>
    tpu.vector_store %arg13[%c17, %c0_17, %c0_18], %25 {strides = array<i32>} : memref<18x25x4xf32, #tpu.memory_space<vmem>>, vector<1x25x4xf32>,
    %cst_19 = arith.constant 0.000000e+00 : f32
    %26 = vector.broadcast %cst_19 : f32 to vector<18x1x4xf32>
    %c0_20 = arith.constant 0 : index
    %c7 = arith.constant 7 : index
    %c0_21 = arith.constant 0 : index
    %27 = vector.load %arg13[%c0_20, %c7, %c0_21] : memref<18x25x4xf32, #tpu.memory_space<vmem>>, vector<18x1x4xf32>
    tpu.vector_store %arg13[%c0_20, %c7, %c0_21], %26 {strides = array<i32>} : memref<18x25x4xf32, #tpu.memory_space<vmem>>, vector<18x1x4xf32>,
    %c0_22 = arith.constant 0 : index
    %c24 = arith.constant 24 : index
    %c0_23 = arith.constant 0 : index
    %28 = vector.load %arg13[%c0_22, %c24, %c0_23] : memref<18x25x4xf32, #tpu.memory_space<vmem>>, vector<18x1x4xf32>
    tpu.vector_store %arg13[%c0_22, %c24, %c0_23], %26 {strides = array<i32>} : memref<18x25x4xf32, #tpu.memory_space<vmem>>, vector<18x1x4xf32>,
    %29 = vector.shape_cast %18 : vector<256x4xf32> to vector<16x16x4xf32>
    %c1 = arith.constant 1 : index
    %c8 = arith.constant 8 : index
    %c0_24 = arith.constant 0 : index
    %30 = vector.load %arg13[%c1, %c8, %c0_24] : memref<18x25x4xf32, #tpu.memory_space<vmem>>, vector<16x16x4xf32>
    tpu.vector_store %arg13[%c1, %c8, %c0_24], %29 {strides = array<i32>} : memref<18x25x4xf32, #tpu.memory_space<vmem>>, vector<16x16x4xf32>,
    %c0_25 = arith.constant 0 : index
    %c7_26 = arith.constant 7 : index
    %c0_27 = arith.constant 0 : index
    %31 = tpu.strided_load %arg13[%c0_25, %c7_26, %c0_27] {strides = array<i32: 2, 2, 1>} : memref<18x25x4xf32, #tpu.memory_space<vmem>>, vector<8x8x4xf32>
    %32 = arith.truncf %31 : vector<8x8x4xf32> to vector<8x8x4xbf16>
    %c0_28 = arith.constant 0 : index
    %c0_29 = arith.constant 0 : index
    %c0_30 = arith.constant 0 : index
    %33 = vector.load %arg14[%c0_28, %c0_29, %c0_30] : memref<8x8x36xbf16, #tpu.memory_space<vmem>>, vector<8x8x4xbf16>
    tpu.vector_store %arg14[%c0_28, %c0_29, %c0_30], %32 {strides = array<i32>} : memref<8x8x36xbf16, #tpu.memory_space<vmem>>, vector<8x8x4xbf16>,
    %c0_31 = arith.constant 0 : index
    %c8_32 = arith.constant 8 : index
    %c0_33 = arith.constant 0 : index
    %34 = tpu.strided_load %arg13[%c0_31, %c8_32, %c0_33] {strides = array<i32: 2, 2, 1>} : memref<18x25x4xf32, #tpu.memory_space<vmem>>, vector<8x8x4xf32>
    %35 = arith.truncf %34 : vector<8x8x4xf32> to vector<8x8x4xbf16>
    %c0_34 = arith.constant 0 : index
    %c0_35 = arith.constant 0 : index
    %c4 = arith.constant 4 : index
    %36 = vector.load %arg14[%c0_34, %c0_35, %c4] : memref<8x8x36xbf16, #tpu.memory_space<vmem>>, vector<8x8x4xbf16>
    tpu.vector_store %arg14[%c0_34, %c0_35, %c4], %35 {strides = array<i32>} : memref<8x8x36xbf16, #tpu.memory_space<vmem>>, vector<8x8x4xbf16>,
    %c0_36 = arith.constant 0 : index
    %c9 = arith.constant 9 : index
    %c0_37 = arith.constant 0 : index
    %37 = tpu.strided_load %arg13[%c0_36, %c9, %c0_37] {strides = array<i32: 2, 2, 1>} : memref<18x25x4xf32, #tpu.memory_space<vmem>>, vector<8x8x4xf32>
    %38 = arith.truncf %37 : vector<8x8x4xf32> to vector<8x8x4xbf16>
    %c0_38 = arith.constant 0 : index
    %c0_39 = arith.constant 0 : index
    %c8_40 = arith.constant 8 : index
    %39 = vector.load %arg14[%c0_38, %c0_39, %c8_40] : memref<8x8x36xbf16, #tpu.memory_space<vmem>>, vector<8x8x4xbf16>
    tpu.vector_store %arg14[%c0_38, %c0_39, %c8_40], %38 {strides = array<i32>} : memref<8x8x36xbf16, #tpu.memory_space<vmem>>, vector<8x8x4xbf16>,
    %c1_41 = arith.constant 1 : index
    %c7_42 = arith.constant 7 : index
    %c0_43 = arith.constant 0 : index
    %40 = tpu.strided_load %arg13[%c1_41, %c7_42, %c0_43] {strides = array<i32: 2, 2, 1>} : memref<18x25x4xf32, #tpu.memory_space<vmem>>, vector<8x8x4xf32>
    %41 = arith.truncf %40 : vector<8x8x4xf32> to vector<8x8x4xbf16>
    %c0_44 = arith.constant 0 : index
    %c0_45 = arith.constant 0 : index
    %c12 = arith.constant 12 : index
    %42 = vector.load %arg14[%c0_44, %c0_45, %c12] : memref<8x8x36xbf16, #tpu.memory_space<vmem>>, vector<8x8x4xbf16>
    tpu.vector_store %arg14[%c0_44, %c0_45, %c12], %41 {strides = array<i32>} : memref<8x8x36xbf16, #tpu.memory_space<vmem>>, vector<8x8x4xbf16>,
    %c1_46 = arith.constant 1 : index
    %c8_47 = arith.constant 8 : index
    %c0_48 = arith.constant 0 : index
    %43 = tpu.strided_load %arg13[%c1_46, %c8_47, %c0_48] {strides = array<i32: 2, 2, 1>} : memref<18x25x4xf32, #tpu.memory_space<vmem>>, vector<8x8x4xf32>
    %44 = arith.truncf %43 : vector<8x8x4xf32> to vector<8x8x4xbf16>
    %c0_49 = arith.constant 0 : index
    %c0_50 = arith.constant 0 : index
    %c16 = arith.constant 16 : index
    %45 = vector.load %arg14[%c0_49, %c0_50, %c16] : memref<8x8x36xbf16, #tpu.memory_space<vmem>>, vector<8x8x4xbf16>
    tpu.vector_store %arg14[%c0_49, %c0_50, %c16], %44 {strides = array<i32>} : memref<8x8x36xbf16, #tpu.memory_space<vmem>>, vector<8x8x4xbf16>,
    %c1_51 = arith.constant 1 : index
    %c9_52 = arith.constant 9 : index
    %c0_53 = arith.constant 0 : index
    %46 = tpu.strided_load %arg13[%c1_51, %c9_52, %c0_53] {strides = array<i32: 2, 2, 1>} : memref<18x25x4xf32, #tpu.memory_space<vmem>>, vector<8x8x4xf32>
    %47 = arith.truncf %46 : vector<8x8x4xf32> to vector<8x8x4xbf16>
    %c0_54 = arith.constant 0 : index
    %c0_55 = arith.constant 0 : index
    %c20 = arith.constant 20 : index
    %48 = vector.load %arg14[%c0_54, %c0_55, %c20] : memref<8x8x36xbf16, #tpu.memory_space<vmem>>, vector<8x8x4xbf16>
    tpu.vector_store %arg14[%c0_54, %c0_55, %c20], %47 {strides = array<i32>} : memref<8x8x36xbf16, #tpu.memory_space<vmem>>, vector<8x8x4xbf16>,
    %c2 = arith.constant 2 : index
    %c7_56 = arith.constant 7 : index
    %c0_57 = arith.constant 0 : index
    %49 = tpu.strided_load %arg13[%c2, %c7_56, %c0_57] {strides = array<i32: 2, 2, 1>} : memref<18x25x4xf32, #tpu.memory_space<vmem>>, vector<8x8x4xf32>
    %50 = arith.truncf %49 : vector<8x8x4xf32> to vector<8x8x4xbf16>
    %c0_58 = arith.constant 0 : index
    %c0_59 = arith.constant 0 : index
    %c24_60 = arith.constant 24 : index
    %51 = vector.load %arg14[%c0_58, %c0_59, %c24_60] : memref<8x8x36xbf16, #tpu.memory_space<vmem>>, vector<8x8x4xbf16>
    tpu.vector_store %arg14[%c0_58, %c0_59, %c24_60], %50 {strides = array<i32>} : memref<8x8x36xbf16, #tpu.memory_space<vmem>>, vector<8x8x4xbf16>,
    %c2_61 = arith.constant 2 : index
    %c8_62 = arith.constant 8 : index
    %c0_63 = arith.constant 0 : index
    %52 = tpu.strided_load %arg13[%c2_61, %c8_62, %c0_63] {strides = array<i32: 2, 2, 1>} : memref<18x25x4xf32, #tpu.memory_space<vmem>>, vector<8x8x4xf32>
    %53 = arith.truncf %52 : vector<8x8x4xf32> to vector<8x8x4xbf16>
    %c0_64 = arith.constant 0 : index
    %c0_65 = arith.constant 0 : index
    %c28 = arith.constant 28 : index
    %54 = vector.load %arg14[%c0_64, %c0_65, %c28] : memref<8x8x36xbf16, #tpu.memory_space<vmem>>, vector<8x8x4xbf16>
    tpu.vector_store %arg14[%c0_64, %c0_65, %c28], %53 {strides = array<i32>} : memref<8x8x36xbf16, #tpu.memory_space<vmem>>, vector<8x8x4xbf16>,
    %c2_66 = arith.constant 2 : index
    %c9_67 = arith.constant 9 : index
    %c0_68 = arith.constant 0 : index
    %55 = tpu.strided_load %arg13[%c2_66, %c9_67, %c0_68] {strides = array<i32: 2, 2, 1>} : memref<18x25x4xf32, #tpu.memory_space<vmem>>, vector<8x8x4xf32>
    %56 = arith.truncf %55 : vector<8x8x4xf32> to vector<8x8x4xbf16>
    %c0_69 = arith.constant 0 : index
    %c0_70 = arith.constant 0 : index
    %c32 = arith.constant 32 : index
    %57 = vector.load %arg14[%c0_69, %c0_70, %c32] : memref<8x8x36xbf16, #tpu.memory_space<vmem>>, vector<8x8x4xbf16>
    tpu.vector_store %arg14[%c0_69, %c0_70, %c32], %56 {strides = array<i32>} : memref<8x8x36xbf16, #tpu.memory_space<vmem>>, vector<8x8x4xbf16>,
    %c0_71 = arith.constant 0 : index
    %c0_72 = arith.constant 0 : index
    %c0_73 = arith.constant 0 : index
    %58 = vector.load %arg14[%c0_71, %c0_72, %c0_73] : memref<8x8x36xbf16, #tpu.memory_space<vmem>>, vector<8x8x36xbf16>
    %59 = vector.shape_cast %58 : vector<8x8x36xbf16> to vector<64x36xbf16>
    %c0_74 = arith.constant 0 : index
    %c0_75 = arith.constant 0 : index
    %60 = vector.load %arg6[%c0_74, %c0_75] : memref<36x4xbf16, #tpu.memory_space<vmem>>, vector<36x4xbf16>
    %cst_76 = arith.constant dense<0.000000e+00> : vector<64x4xf32>
    %61 = tpu.matmul %59, %60, %cst_76 {dimension_numbers = #tpu.dot_dimension_numbers<[1], [0], [0], [1], [0, 0, 1, 1], [], []>} : vector<64x36xbf16>, vector<36x4xbf16>, vector<64x4xf32> -> vector<64x4xf32>
    %c0_77 = arith.constant 0 : index
    %c0_78 = arith.constant 0 : index
    %62 = vector.load %arg7[%c0_77, %c0_78] : memref<1x4xf32, #tpu.memory_space<vmem>>, vector<1x4xf32>
    %63 = vector.broadcast %62 : vector<1x4xf32> to vector<64x4xf32>
    %64 = arith.addf %61, %63 : vector<64x4xf32>
    %cst_79 = arith.constant 0.000000e+00 : f32
    %65 = vector.broadcast %cst_79 : f32 to vector<64x4xf32>
    %66 = arith.maximumf %64, %65 : vector<64x4xf32>
    %67 = arith.truncf %66 : vector<64x4xf32> to vector<64x4xbf16>
    %c0_80 = arith.constant 0 : index
    %c0_81 = arith.constant 0 : index
    %68 = vector.load %arg8[%c0_80, %c0_81] : memref<4x16xbf16, #tpu.memory_space<vmem>>, vector<4x16xbf16>
    %cst_82 = arith.constant dense<0.000000e+00> : vector<64x16xf32>
    %69 = tpu.matmul %67, %68, %cst_82 {dimension_numbers = #tpu.dot_dimension_numbers<[1], [0], [0], [1], [0, 0, 1, 1], [], []>} : vector<64x4xbf16>, vector<4x16xbf16>, vector<64x16xf32> -> vector<64x16xf32>
    %c0_83 = arith.constant 0 : index
    %c0_84 = arith.constant 0 : index
    %70 = vector.load %arg9[%c0_83, %c0_84] : memref<1x16xf32, #tpu.memory_space<vmem>>, vector<1x16xf32>
    %71 = vector.broadcast %70 : vector<1x16xf32> to vector<64x16xf32>
    %72 = arith.addf %69, %71 : vector<64x16xf32>
    %cst_85 = arith.constant 0.000000e+00 : f32
    %73 = vector.broadcast %cst_85 : f32 to vector<64x16xf32>
    %74 = arith.maximumf %72, %73 : vector<64x16xf32>
    %c0_86 = arith.constant 0 : index
    %c0_87 = arith.constant 0 : index
    %c0_88 = arith.constant 0 : index
    %75 = vector.load %arg12[%c0_86, %c0_87, %c0_88] : memref<1x64x16xf32, #tpu.memory_space<vmem>>, vector<1x64x16xf32>
    %76 = vector.shape_cast %75 : vector<1x64x16xf32> to vector<64x16xf32>
    %77 = vector.shape_cast %74 : vector<64x16xf32> to vector<1x64x16xf32>
    tpu.vector_store %arg12[%c0_86, %c0_87, %c0_88], %77 {strides = array<i32>} : memref<1x64x16xf32, #tpu.memory_space<vmem>>, vector<1x64x16xf32>,
    %c0_89 = arith.constant 0 : index
    %c0_90 = arith.constant 0 : index
    %c0_91 = arith.constant 0 : index
    %c0_92 = arith.constant 0 : index
    %78 = tpu.strided_load %arg1[%c0_89, %c0_90, %c0_91, %c0_92] {strides = array<i32: 1, 2, 2, 1>} : memref<1x16x16x16xf32, #tpu.memory_space<vmem>>, vector<1x8x8x16xf32>
    %79 = vector.shape_cast %78 : vector<1x8x8x16xf32> to vector<8x8x16xf32>
    %80 = vector.shape_cast %79 : vector<8x8x16xf32> to vector<64x16xf32>
    %81 = arith.truncf %80 : vector<64x16xf32> to vector<64x16xbf16>
    %c0_93 = arith.constant 0 : index
    %c0_94 = arith.constant 0 : index
    %82 = vector.load %arg10[%c0_93, %c0_94] : memref<16x16xbf16, #tpu.memory_space<vmem>>, vector<16x16xbf16>
    %cst_95 = arith.constant dense<0.000000e+00> : vector<64x16xf32>
    %83 = tpu.matmul %81, %82, %cst_95 {dimension_numbers = #tpu.dot_dimension_numbers<[1], [0], [0], [1], [0, 0, 1, 1], [], []>} : vector<64x16xbf16>, vector<16x16xbf16>, vector<64x16xf32> -> vector<64x16xf32>
    %c0_96 = arith.constant 0 : index
    %c0_97 = arith.constant 0 : index
    %84 = vector.load %arg11[%c0_96, %c0_97] : memref<1x16xf32, #tpu.memory_space<vmem>>, vector<1x16xf32>
    %85 = vector.broadcast %84 : vector<1x16xf32> to vector<64x16xf32>
    %86 = arith.addf %83, %85 : vector<64x16xf32>
    %cst_98 = arith.constant 0.000000e+00 : f32
    %87 = vector.broadcast %cst_98 : f32 to vector<64x16xf32>
    %88 = arith.maximumf %86, %87 : vector<64x16xf32>
    %c0_99 = arith.constant 0 : index
    %c0_100 = arith.constant 0 : index
    %c0_101 = arith.constant 0 : index
    %89 = vector.load %arg12[%c0_99, %c0_100, %c0_101] : memref<1x64x16xf32, #tpu.memory_space<vmem>>, vector<1x64x16xf32>
    %90 = vector.shape_cast %89 : vector<1x64x16xf32> to vector<64x16xf32>
    %91 = arith.addf %90, %88 : vector<64x16xf32>
    %cst_102 = arith.constant 0.000000e+00 : f32
    %92 = vector.broadcast %cst_102 : f32 to vector<64x16xf32>
    %93 = arith.maximumf %91, %92 : vector<64x16xf32>
    %c0_103 = arith.constant 0 : index
    %c0_104 = arith.constant 0 : index
    %c0_105 = arith.constant 0 : index
    %94 = vector.load %arg12[%c0_103, %c0_104, %c0_105] : memref<1x64x16xf32, #tpu.memory_space<vmem>>, vector<1x64x16xf32>
    %95 = vector.shape_cast %94 : vector<1x64x16xf32> to vector<64x16xf32>
    %96 = vector.shape_cast %93 : vector<64x16xf32> to vector<1x64x16xf32>
    tpu.vector_store %arg12[%c0_103, %c0_104, %c0_105], %96 {strides = array<i32>} : memref<1x64x16xf32, #tpu.memory_space<vmem>>, vector<1x64x16xf32>,
    return
  }
  func.func @transform_0(%arg0: i32) -> (i32, i32, i32, i32) {
    %c0_i32 = arith.constant 0 : i32
    %c0_i32_0 = arith.constant 0 : i32
    %c0_i32_1 = arith.constant 0 : i32
    %c0_i32_2 = arith.constant 0 : i32
    return %arg0, %c0_i32, %c0_i32_0, %c0_i32_1 : i32, i32, i32, i32
  }
  func.func @transform_1(%arg0: i32) -> (i32, i32) {
    %c0_i32 = arith.constant 0 : i32
    %c0_i32_0 = arith.constant 0 : i32
    %c0_i32_1 = arith.constant 0 : i32
    return %c0_i32, %c0_i32_0 : i32, i32
  }
  func.func @transform_2(%arg0: i32) -> (i32, i32) {
    %c0_i32 = arith.constant 0 : i32
    %c0_i32_0 = arith.constant 0 : i32
    %c0_i32_1 = arith.constant 0 : i32
    return %c0_i32, %c0_i32_0 : i32, i32
  }
  func.func @transform_3(%arg0: i32) -> (i32, i32) {
    %c0_i32 = arith.constant 0 : i32
    %c0_i32_0 = arith.constant 0 : i32
    %c0_i32_1 = arith.constant 0 : i32
    return %c0_i32, %c0_i32_0 : i32, i32
  }
  func.func @transform_4(%arg0: i32) -> (i32, i32) {
    %c0_i32 = arith.constant 0 : i32
    %c0_i32_0 = arith.constant 0 : i32
    %c0_i32_1 = arith.constant 0 : i32
    return %c0_i32, %c0_i32_0 : i32, i32
  }
  func.func @transform_5(%arg0: i32) -> (i32, i32) {
    %c0_i32 = arith.constant 0 : i32
    %c0_i32_0 = arith.constant 0 : i32
    %c0_i32_1 = arith.constant 0 : i32
    return %c0_i32, %c0_i32_0 : i32, i32
  }
  func.func @transform_6(%arg0: i32) -> (i32, i32) {
    %c0_i32 = arith.constant 0 : i32
    %c0_i32_0 = arith.constant 0 : i32
    %c0_i32_1 = arith.constant 0 : i32
    return %c0_i32, %c0_i32_0 : i32, i32
  }
  func.func @transform_7(%arg0: i32) -> (i32, i32) {
    %c0_i32 = arith.constant 0 : i32
    %c0_i32_0 = arith.constant 0 : i32
    %c0_i32_1 = arith.constant 0 : i32
    return %c0_i32, %c0_i32_0 : i32, i32
  }
  func.func @transform_8(%arg0: i32) -> (i32, i32) {
    %c0_i32 = arith.constant 0 : i32
    %c0_i32_0 = arith.constant 0 : i32
    %c0_i32_1 = arith.constant 0 : i32
    return %c0_i32, %c0_i32_0 : i32, i32
  }
  func.func @transform_9(%arg0: i32) -> (i32, i32) {
    %c0_i32 = arith.constant 0 : i32
    %c0_i32_0 = arith.constant 0 : i32
    %c0_i32_1 = arith.constant 0 : i32
    return %c0_i32, %c0_i32_0 : i32, i32
  }
  func.func @transform_10(%arg0: i32) -> (i32, i32) {
    %c0_i32 = arith.constant 0 : i32
    %c0_i32_0 = arith.constant 0 : i32
    %c0_i32_1 = arith.constant 0 : i32
    return %c0_i32, %c0_i32_0 : i32, i32
  }
  func.func @transform_11(%arg0: i32) -> (i32, i32, i32) {
    %c0_i32 = arith.constant 0 : i32
    %c0_i32_0 = arith.constant 0 : i32
    %c0_i32_1 = arith.constant 0 : i32
    return %arg0, %c0_i32, %c0_i32_0 : i32, i32, i32
  }
}

</mosaic_0001>

<bundles_post_ra>
// kernel: bottleneck_forward.1
= control target key start
LH: loop header
LB: loop body
LE: loop exit
PB: predicated region body
PF: predicated region fallthrough
CT: control target
= control target key end

     0   :  { %s3128_s0 = inlined_call_operand.vmem [shape: f32[2,16,16,16], index: 0, kind: input, shape index: {}]   ;;  %s3129_s1 = inlined_call_operand.vmem [shape: f32[1,16], index: 1, kind: input, shape index: {}]   ;;  %s3130_s2 = inlined_call_operand.vmem [shape: f32[1,16], index: 2, kind: input, shape index: {}]   ;;  %s3131_s3 = inlined_call_operand.vmem [shape: bf16[16,4], index: 3, kind: input, shape index: {}]   ;;  %s3132_s4 = inlined_call_operand.vmem [shape: f32[1,4], index: 4, kind: input, shape index: {}]   ;;  %s3133_s5 = inlined_call_operand.vmem [shape: bf16[36,4], index: 5, kind: input, shape index: {}]   ;;  %s3134_s6 = inlined_call_operand.vmem [shape: f32[1,4], index: 6, kind: input, shape index: {}]   ;;  %s3135_s7 = inlined_call_operand.vmem [shape: bf16[4,16], index: 7, kind: input, shape index: {}]   ;;  %s3136_s8 = inlined_call_operand.vmem [shape: f32[1,16], index: 8, kind: input, shape index: {}]   ;;  %s3137_s9 = inlined_call_operand.vmem [shape: bf16[16,16], index: 9, kind: input, shape index: {}]   ;;  %s3138_s10 = inlined_call_operand.vmem [shape: f32[1,16], index: 10, kind: input, shape index: {}]   ;;  %s3139_s11 = inlined_call_operand.hbm [shape: f32[2,64,16], index: 11, kind: output, shape index: {}]  }
   0x1   :  { %3147 = sst [smem:[#allocation7_spill]] %s3128_s0 }
   0x2   :  { %16 = vsyncpa [#allocation5], 0 }
   0x3   :  { %18 = vsyncpa [#allocation5 + $0x1], 0  ;;  %s2578_s17 = smov 0   ;;  %s2580_s18 = smov 0  }
   0x4   :  { %s2582_s19 = smov 0   ;;  %s2584_s20 = smov 0  }
   0x5 LB: > { %s2599_s21 = sadd.s32 4294967295, %s2505_s20   ;;  %s2091_s22 = sadd.s32 4294967294, %s2505_s20   ;;  %s2505_s20 = sphi %s2584_s20, %s3158_s20   ;;  %s2501_s19 = sphi %s2582_s19, %s3157_s19   ;;  %s2497_s18 = sphi %s2580_s18, %s3156_s18   ;;  %s2493_s17 = sphi %s2578_s17, %s3155_s17  }
   0x6   : > { %s2603_s23 = sadd.s32 1, %s2505_s20   ;;  %s267_s24 = sadd.s32 1, %s2501_s19 }
   0x7   : > { %s264_s25 = ssub.s32 %s2505_s20, %s2603_s23  ;;  %p277_p0 = scmp.ne.s32.totalorder %s2501_s19, %s2497_s18 }
   0x8   : > { %p265_p1 = scmp.eq.s32.totalorder %s264_s25, 0  ;;  %p278_p2 = scmp.eq.s32.totalorder %s2599_s21, 1 }
   0x9   : > { %p283_p3 = scmp.ne.s32.totalorder %s2497_s18, %s2493_s17  ;;  %p284_p4 = scmp.eq.s32.totalorder %s2091_s22, 1 }
   0xa   : > { %s2614_s26 = scalar_select %p265_p1, %s2501_s19, %s267_s24  }
   0xb   : > { %p2616_p5 = por %p278_p2, %p277_p0  ;;  %p2620_p6 = por %p284_p4, %p283_p3 }
   0xc   : > { %p2094_p7 = scmp.ge.s32.totalorder %s2505_s20, 1  ;;  %p340_p8 = scmp.lt.s32.totalorder %s2505_s20, 3 }
   0xe   : > { %p341_p9 = pnand %p2094_p7, %p340_p8 }
   0xf   : > { %p380_p10 = scmp.lt.s32.totalorder (!%p341_p9), %s2599_s21, 1  ;;  %s3150_s0 = sld [smem:[#allocation7_spill]] (!%p341_p9) }
  0x10   : > { %344 = sbr.rel (%p341_p9) target bundleno = 940 (0x3ac), region = 64  ;;  %s2508_s30 = smov (!%p341_p9), 4  }
  0x11   : > { %s3144_s16 = smov (!%p341_p9), 28   ;;  %s3142_s22 = smov (!%p341_p9), 32  }
  0x12   : > { %s2513_s25 = smov (!%p341_p9), 12   ;;  %s2514_s29 = smov (!%p341_p9), 16  }
  0x13   : > { %s2515_s13 = smov (!%p341_p9), 20   ;;  %s2282_s14 = sshll.u32 (!%p341_p9), %s2599_s21, 10 }
  0x15   : > { %v2436_v0 = vld [vmem:[%s3131_s3] sm:$0xff]   ;;  %s381_s12 = scalar_select %p380_p10, %s2599_s21, 1  ;;  %vm559_vm0 = vcmask 130048   ;;  %vm801_vm1 = vcmask 31744   ;;  %vm805_vm2 = vcmask 24576   ;;  %vm905_vm3 = vcmask 27648  }
  0x16   : > { %2317 = vmatprep.subr.bf16.mxu0 %v2436_v0  ;;  %v2634_v1 = vld [vmem:[%s3129_s1] ss:$0 sm:$0xff]  ;;  %vm986_vm4 = vcmask 60448   ;;  %vm1067_vm5 = vcmask 93248   ;;  %vm1631_vm6 = vcmask 1041408   ;;  %vm1148_vm7 = vcmask 126048  }
  0x17   : > { %2318 = vmatpush3.bf16.msra.mxu0 %v2436_v0  ;;  %s2217_s15 = sshll.u32 %s381_s12, 8  ;;  %v2644_v2 = vld [vmem:[%s3130_s2] ss:$0 sm:$0xff]  ;;  %s3146_s12 = smov 8   ;;  %vm1229_vm8 = vcmask 158848   ;;  %vm1310_vm9 = vcmask 191648  }
  0x18   : > { %s2639_s24 = scalar_lea.vmem %s3150_s0, %s2217_s15  ;;  %s3140_s15 = smov 24   ;;  %vm1392_vm10 = vcmask 224448   ;;  %vm1473_vm11 = vcmask 257248   ;;  %vm1554_vm12 = vcmask 290048   ;;  %vm1618_vm13 = vcmask 293888  }
  0x19   : > { %v386_v3 = vld [vmem:[%s2639_s24] sm:$0xff]  ;;  %v387_v4 = vld [vmem:[%s2639_s24 + $0x8] sm:$0xff]  ;;  %v388_v5 = vld [vmem:[%s2639_s24 + $0x10] sm:$0xff] }
  0x1a   : > { %v425_v6 = vmul.f32 %v2634_v1, %v386_v3  ;;  %v426_v7 = vmul.f32 %v2634_v1, %v387_v4  ;;  %v389_v8 = vld [vmem:[%s2639_s24 + $0x18] sm:$0xff]  ;;  %v427_v9 = vmul.f32 %v2634_v1, %v388_v5  ;;  %v390_v10 = vld [vmem:[%s2639_s24 + $0x20] sm:$0xff]  ;;  %v391_v11 = vld [vmem:[%s2639_s24 + $0x28] sm:$0xff] }
  0x1b   : > { %v428_v12 = vmul.f32 %v2634_v1, %v389_v8  ;;  %v429_v13 = vmul.f32 %v2634_v1, %v390_v10  ;;  %v430_v14 = vmul.f32 %v2634_v1, %v391_v11  ;;  %v392_v15 = vld [vmem:[%s2639_s24 + $0x30] sm:$0xff]  ;;  %v393_v16 = vld [vmem:[%s2639_s24 + $0x38] sm:$0xff]  ;;  %v394_v25 = vld [vmem:[%s2639_s24 + $0x40] sm:$0xff] }
  0x1c   : > { %v464_v17 = vadd.f32 %v2644_v2, %v425_v6  ;;  %v465_v18 = vadd.f32 %v2644_v2, %v426_v7  ;;  %v466_v19 = vadd.f32 %v2644_v2, %v427_v9  ;;  %v431_v20 = vmul.f32 %v2634_v1, %v392_v15  ;;  %v395_v26 = vld [vmem:[%s2639_s24 + $0x48] sm:$0xff]  ;;  %v396_v38 = vld [vmem:[%s2639_s24 + $0x50] sm:$0xff]  ;;  %v397_v39 = vld [vmem:[%s2639_s24 + $0x58] sm:$0xff] }
  0x1d   : > { %v467_v21 = vadd.f32 %v2644_v2, %v428_v12  ;;  %v468_v22 = vadd.f32 %v2644_v2, %v429_v13  ;;  %v469_v23 = vadd.f32 %v2644_v2, %v430_v14  ;;  %v432_v24 = vmul.f32 %v2634_v1, %v393_v16  ;;  %v398_v42 = vld [vmem:[%s2639_s24 + $0x60] sm:$0xff]  ;;  %v399_v43 = vld [vmem:[%s2639_s24 + $0x68] sm:$0xff]  ;;  %v400_v60 = vld [vmem:[%s2639_s24 + $0x70] sm:$0xff] }
  0x1e   : > { %v496_v27 = vmax.f32 %v464_v17, 0.0  ;;  %v497_v28 = vmax.f32 %v465_v18, 0.0  ;;  %v498_v29 = vmax.f32 %v466_v19, 0.0  ;;  %v470_v30 = vadd.f32 %v2644_v2, %v431_v20  ;;  %v401_v61 = vld [vmem:[%s2639_s24 + $0x78] sm:$0xff]  ;;  %v402_v62 = vld [vmem:[%s2639_s24 + $0x80] sm:$0xff]  ;;  %v403_v63 = vld [vmem:[%s2639_s24 + $0x88] sm:$0xff] }
  0x1f   : > { %v499_v31 = vmax.f32 %v467_v21, 0.0  ;;  %v500_v32 = vmax.f32 %v468_v22, 0.0  ;;  %v501_v33 = vmax.f32 %v469_v23, 0.0  ;;  %v471_v34 = vadd.f32 %v2644_v2, %v432_v24  ;;  %v404_v16 = vld [vmem:[%s2639_s24 + $0x90] sm:$0xff]  ;;  %v405_v17 = vld [vmem:[%s2639_s24 + $0x98] sm:$0xff]  ;;  %v406_v18 = vld [vmem:[%s2639_s24 + $0xa0] sm:$0xff] }
  0x20   : > { %v528_v35 = vpack.c.bf16 %v497_v28, %v496_v27  ;;  %v433_v36 = vmul.f32 %v2634_v1, %v394_v25  ;;  %v434_v37 = vmul.f32 %v2634_v1, %v395_v26  ;;  %v502_v46 = vmax.f32 %v470_v30, 0.0  ;;  %v407_v19 = vld [vmem:[%s2639_s24 + $0xa8] sm:$0xff] }
  0x21   : > { %v529_v40 = vpack.c.bf16 %v499_v31, %v498_v29  ;;  %v530_v41 = vpack.c.bf16 %v501_v33, %v500_v32  ;;  %v503_v47 = vmax.f32 %v471_v34, 0.0  ;;  %v435_v48 = vmul.f32 %v2634_v1, %v396_v38  ;;  %v408_v34 = vld [vmem:[%s2639_s24 + $0xb0] sm:$0xff] }
  0x22   : > { %2319 = vmatprep.mubr.msk.bf16.mxu0 %vm559_vm0, %v528_v35  ;;  %v472_v44 = vadd.f32 %v2644_v2, %v433_v36  ;;  %v473_v45 = vadd.f32 %v2644_v2, %v434_v37  ;;  %v436_v49 = vmul.f32 %v2634_v1, %v397_v39  ;;  %v437_v52 = vmul.f32 %v2634_v1, %v398_v42  ;;  %v409_v35 = vld [vmem:[%s2639_s24 + $0xb8] sm:$0xff]  ;;  %v410_v36 = vld [vmem:[%s2639_s24 + $0xc0] sm:$0xff]  ;;  %v411_v37 = vld [vmem:[%s2639_s24 + $0xc8] sm:$0xff] }
  0x23   : > { %2320 = vmatmul.mubr.msk.bf16.vlgmr.msra.gmra.mxu0 %vm559_vm0, %v529_v40  ;;  %v438_v53 = vmul.f32 %v2634_v1, %v399_v43  ;;  %v531_v54 = vpack.c.bf16 %v503_v47, %v502_v46  ;;  %v474_v55 = vadd.f32 %v2644_v2, %v435_v48  ;;  %v439_v4 = vmul.f32 %v2634_v1, %v400_v60 }
  0x24   : > { %2323 = vmatprep.mubr.msk.bf16.mxu0 %vm559_vm0, %v530_v41  ;;  %v504_v50 = vmax.f32 %v472_v44, 0.0  ;;  %v505_v51 = vmax.f32 %v473_v45, 0.0  ;;  %v475_v56 = vadd.f32 %v2644_v2, %v436_v49  ;;  %v476_v58 = vadd.f32 %v2644_v2, %v437_v52  ;;  %v412_v52 = vld [vmem:[%s2639_s24 + $0xd0] sm:$0xff] }
  0x25   : > { %v477_v59 = vadd.f32 %v2644_v2, %v438_v53  ;;  %v506_v0 = vmax.f32 %v474_v55, 0.0  ;;  %v440_v5 = vmul.f32 %v2634_v1, %v401_v61  ;;  %v441_v8 = vmul.f32 %v2634_v1, %v402_v62  ;;  %v413_v53 = vld [vmem:[%s2639_s24 + $0xd8] sm:$0xff]  ;;  %v415_v55 = vld [vmem:[%s2639_s24 + $0xe8] sm:$0xff] }
  0x26   : > { %v532_v57 = vpack.c.bf16 %v505_v51, %v504_v50  ;;  %v507_v3 = vmax.f32 %v475_v56, 0.0  ;;  %v508_v6 = vmax.f32 %v476_v58, 0.0  ;;  %v442_v9 = vmul.f32 %v2634_v1, %v403_v63 }
  0x27   : > { %v509_v7 = vmax.f32 %v477_v59, 0.0  ;;  %v478_v11 = vadd.f32 %v2644_v2, %v439_v4  ;;  %v479_v12 = vadd.f32 %v2644_v2, %v440_v5  ;;  %v480_v14 = vadd.f32 %v2644_v2, %v441_v8  ;;  %v416_v8 = vld [vmem:[%s2639_s24 + $0xf0] sm:$0xff] }
  0x28   : > { %v533_v10 = vpack.c.bf16 %v507_v3, %v506_v0  ;;  %v481_v15 = vadd.f32 %v2644_v2, %v442_v9  ;;  %v443_v22 = vmul.f32 %v2634_v1, %v404_v16  ;;  %v444_v23 = vmul.f32 %v2634_v1, %v405_v17  ;;  %v417_v9 = vld [vmem:[%s2639_s24 + $0xf8] sm:$0xff] }
  0x29   : > { %v534_v13 = vpack.c.bf16 %v509_v7, %v508_v6  ;;  %v510_v20 = vmax.f32 %v478_v11, 0.0  ;;  %v511_v21 = vmax.f32 %v479_v12, 0.0  ;;  %v512_v24 = vmax.f32 %v480_v14, 0.0 }
  0x2a   : > { %v513_v25 = vmax.f32 %v481_v15, 0.0  ;;  %v445_v26 = vmul.f32 %v2634_v1, %v406_v18  ;;  %v446_v27 = vmul.f32 %v2634_v1, %v407_v19  ;;  %v482_v29 = vadd.f32 %v2644_v2, %v443_v22 }
  0x2b   : > { %2324 = vmatmul.mubr.msk.bf16.gmra.mxu0 %vm559_vm0, %v531_v54  ;;  %v535_v28 = vpack.c.bf16 %v511_v21, %v510_v20  ;;  %v483_v30 = vadd.f32 %v2644_v2, %v444_v23  ;;  %v447_v40 = vmul.f32 %v2634_v1, %v408_v34  ;;  %v448_v41 = vmul.f32 %v2634_v1, %v409_v35  ;;  %v414_v54 = vld [vmem:[%s2639_s24 + $0xe0] sm:$0xff] }
  0x2c   : > { %2327 = vmatprep.mubr.msk.bf16.mxu0 %vm559_vm0, %v532_v57  ;;  %v536_v31 = vpack.c.bf16 %v513_v25, %v512_v24  ;;  %v484_v32 = vadd.f32 %v2644_v2, %v445_v26  ;;  %v485_v33 = vadd.f32 %v2644_v2, %v446_v27  ;;  %v514_v38 = vmax.f32 %v482_v29, 0.0  ;;  %v2783_v29 = vld [vmem:[%s3132_s4] ss:$0 sm:$0xff] }
  0x2d   : > { %v515_v39 = vmax.f32 %v483_v30, 0.0  ;;  %v449_v44 = vmul.f32 %v2634_v1, %v410_v36  ;;  %v450_v45 = vmul.f32 %v2634_v1, %v411_v37  ;;  %v486_v47 = vadd.f32 %v2644_v2, %v447_v40 }
  0x2e   : > { %v516_v42 = vmax.f32 %v484_v32, 0.0  ;;  %v517_v43 = vmax.f32 %v485_v33, 0.0  ;;  %v487_v48 = vadd.f32 %v2644_v2, %v448_v41  ;;  %v451_v58 = vmul.f32 %v2634_v1, %v412_v52 }
  0x2f   : > { %v537_v46 = vpack.c.bf16 %v515_v39, %v514_v38  ;;  %v488_v50 = vadd.f32 %v2644_v2, %v449_v44  ;;  %v489_v51 = vadd.f32 %v2644_v2, %v450_v45  ;;  %v518_v56 = vmax.f32 %v486_v47, 0.0 }
  0x30   : > { %v538_v49 = vpack.c.bf16 %v517_v43, %v516_v42  ;;  %v519_v57 = vmax.f32 %v487_v48, 0.0  ;;  %v452_v59 = vmul.f32 %v2634_v1, %v413_v53  ;;  %v453_v62 = vmul.f32 %v2634_v1, %v414_v54 }
  0x31   : > { %v520_v60 = vmax.f32 %v488_v50, 0.0  ;;  %v521_v61 = vmax.f32 %v489_v51, 0.0  ;;  %v454_v63 = vmul.f32 %v2634_v1, %v415_v55  ;;  %v490_v3 = vadd.f32 %v2644_v2, %v451_v58 }
  0x32   : > { %v539_v0 = vpack.c.bf16 %v519_v57, %v518_v56  ;;  %v491_v4 = vadd.f32 %v2644_v2, %v452_v59  ;;  %v492_v6 = vadd.f32 %v2644_v2, %v453_v62  ;;  %v455_v12 = vmul.f32 %v2634_v1, %v416_v8 }
  0x33   : > { %2328 = vmatmul.mubr.msk.bf16.gmra.mxu0 %vm559_vm0, %v533_v10  ;;  %v540_v5 = vpack.c.bf16 %v521_v61, %v520_v60  ;;  %v493_v7 = vadd.f32 %v2644_v2, %v454_v63  ;;  %v522_v10 = vmax.f32 %v490_v3, 0.0 }
  0x34   : > { %2331 = vmatprep.mubr.msk.bf16.mxu0 %vm559_vm0, %v534_v13  ;;  %v523_v11 = vmax.f32 %v491_v4, 0.0  ;;  %v456_v13 = vmul.f32 %v2634_v1, %v417_v9  ;;  %v524_v14 = vmax.f32 %v492_v6, 0.0  ;;  %v494_v17 = vadd.f32 %v2644_v2, %v455_v12 }
  0x35   : > { %v525_v15 = vmax.f32 %v493_v7, 0.0  ;;  %v2507_v1 = vmov 0.0  }
  0x36   : > { %v541_v16 = vpack.c.bf16 %v523_v11, %v522_v10  ;;  %v495_v18 = vadd.f32 %v2644_v2, %v456_v13  ;;  %v526_v20 = vmax.f32 %v494_v17, 0.0  ;;  %803 = vst.msk [vmem:[#allocation2 + $0x8] sm:$0xff] %vm801_vm1, %v2507_v1  ;;  %804 = vst.msk [vmem:[#allocation2 + $0x10] sm:$0xff] %vm801_vm1, %v2507_v1 }
  0x37   : > { %v542_v19 = vpack.c.bf16 %v525_v15, %v524_v14  ;;  %802 = vst.msk [vmem:[#allocation2] sm:$0xff] %vm801_vm1, %v2507_v1 }
  0x38   : > { %v527_v21 = vmax.f32 %v495_v18, 0.0  ;;  %814 = vst.msk [vmem:[#allocation2 + $0x47] sm:$0x1] %vm805_vm2, %v2507_v1  ;;  %812 = vst.msk [vmem:[#allocation2 + $0x7] sm:$0x1] %vm805_vm2, %v2507_v1 }
  0x39   : > { %813 = vst.msk [vmem:[#allocation2 + $0x27] sm:$0x1] %vm805_vm2, %v2507_v1  ;;  %815 = vst.msk [vmem:[#allocation2 + $0x67] sm:$0x1] %vm805_vm2, %v2507_v1 }
  0x3a   : > { %v543_v22 = vpack.c.bf16 %v527_v21, %v526_v20  ;;  %816 = vst.msk [vmem:[#allocation2 + $0x87] sm:$0x1] %vm805_vm2, %v2507_v1  ;;  %817 = vst.msk [vmem:[#allocation2 + $0xa7] sm:$0x1] %vm805_vm2, %v2507_v1 }
  0x3b   : > { %2332 = vmatmul.mubr.msk.bf16.gmra.mxu0 %vm559_vm0, %v535_v28  ;;  %818 = vst.msk [vmem:[#allocation2 + $0xc7] sm:$0x1] %vm805_vm2, %v2507_v1  ;;  %819 = vst.msk [vmem:[#allocation2 + $0xe7] sm:$0x1] %vm805_vm2, %v2507_v1 }
  0x3c   : > { %2335 = vmatprep.mubr.msk.bf16.mxu0 %vm559_vm0, %v536_v31  ;;  %820 = vst.msk [vmem:[#allocation2 + $0x107] sm:$0x1] %vm805_vm2, %v2507_v1  ;;  %821 = vst.msk [vmem:[#allocation2 + $0x127] sm:$0x1] %vm805_vm2, %v2507_v1 }
  0x3d   : > { %v915_v23 = vld [vmem:[#allocation2 + $0x8] ss:$2 sm:$0xff]  ;;  %822 = vst.msk [vmem:[#allocation2 + $0x147] sm:$0x1] %vm805_vm2, %v2507_v1  ;;  %823 = vst.msk [vmem:[#allocation2 + $0x167] sm:$0x1] %vm805_vm2, %v2507_v1 }
  0x3e   : > { %v2218_v2 = vpack.c.bf16 %v915_v23, %v915_v23  ;;  %824 = vst.msk [vmem:[#allocation2 + $0x187] sm:$0x1] %vm805_vm2, %v2507_v1  ;;  %825 = vst.msk [vmem:[#allocation2 + $0x1a7] sm:$0x1] %vm805_vm2, %v2507_v1  ;;  %v996_v24 = vld [vmem:[#allocation2 + $0x9] ss:$2 sm:$0xff] }
  0x3f   : > { %826 = vst.msk [vmem:[#allocation2 + $0x1c7] sm:$0x1] %vm805_vm2, %v2507_v1  ;;  %827 = vst.msk [vmem:[#allocation2 + $0x1e7] sm:$0x1] %vm805_vm2, %v2507_v1  ;;  %v2226_v25 = vpack.c.bf16 %v996_v24, %v996_v24  ;;  %v882_v26 = vld [vmem:[#allocation2 + $0x7] ss:$2 sm:$0xff] }
  0x40   : > { %828 = vst.msk [vmem:[#allocation2 + $0x207] sm:$0x1] %vm805_vm2, %v2507_v1  ;;  %962 = vrot.lane.b32.xlu0 %v2218_v2, %s2508_s30  ;;  %v897_v27 = vpack.c.bf16 %v882_v26, %v882_v26 }
  0x42   : > { %906 = vst.msk [vmem:[#allocation3] sm:$0xf] %vm905_vm3, %v897_v27 }
  0x43   : > { %2336 = vmatmul.mubr.msk.bf16.gmra.mxu0 %vm559_vm0, %v537_v46 }
  0x44   : > { %2339 = vmatprep.mubr.msk.bf16.mxu0 %vm559_vm0, %v538_v49  ;;  %1043 = vrot.lane.b32.xlu0 %v2226_v25, %s3146_s12 }
  0x4b   : > { %2340 = vmatmul.mubr.msk.bf16.gmra.mxu0 %vm559_vm0, %v539_v0 }
  0x4c   : > { %2343 = vmatprep.mubr.msk.bf16.mxu0 %vm559_vm0, %v540_v5 }
  0x53   : > { %2344 = vmatmul.mubr.msk.bf16.gmra.mxu0 %vm559_vm0, %v541_v16 }
  0x54   : > { %2347 = vmatprep.mubr.msk.bf16.mxu0 %vm559_vm0, %v542_v19 }
  0x5b   : > { %2348 = vmatmul.mubr.msk.bf16.gmra.mxu0 %vm559_vm0, %v543_v22 }
  0xb2   : > { %v963_v28 = vpop.permute.xlu0 %962 }
  0xb3   : > { %987 = vst.msk [vmem:[#allocation3] sm:$0xf] %vm986_vm4, %v963_v28 }
  0xb6   : > { %v1044_v32 = vpop.permute.xlu0 %1043 }
  0xb7   : > { %1068 = vst.msk [vmem:[#allocation3] sm:$0xf] %vm1067_vm5, %v1044_v32 }
  0xe3   : > { %v2321_v30 = vpop.f32.mrf.mxu0 }
  0xe4   : > { %v651_v31 = vadd.f32 %v2321_v30, %v2783_v29 }
  0xe5   : > { %v642_v33 = vpop.f32.mrf.mxu0 }
  0xe6   : > { %v771_v34 = vmax.f32 %v651_v31, 0.0  ;;  %v643_v35 = vadd.f32 %v2783_v29, %v642_v33 }
  0xe7   : > { %v2322_v36 = vpop.f32.mrf.mxu0 }
  0xe8   : > { %851 = vst.msk [vmem:[#allocation2 + $0x48] sm:$0xff] %vm801_vm1, %v771_v34  ;;  %v769_v37 = vmax.f32 %v643_v35, 0.0  ;;  %v654_v38 = vadd.f32 %v2322_v36, %v2783_v29 }
  0xe9   : > { %v645_v39 = vpop.f32.mrf.mxu0 }
  0xea   : > { %849 = vst.msk [vmem:[#allocation2 + $0x28] sm:$0xff] %vm801_vm1, %v769_v37  ;;  %v772_v40 = vmax.f32 %v654_v38, 0.0  ;;  %v646_v41 = vadd.f32 %v2783_v29, %v645_v39 }
  0xeb   : > { %v2325_v42 = vpop.f32.mrf.mxu0 }
  0xec   : > { %852 = vst.msk [vmem:[#allocation2 + $0x50] sm:$0xff] %vm801_vm1, %v772_v40  ;;  %v770_v43 = vmax.f32 %v646_v41, 0.0  ;;  %v667_v44 = vadd.f32 %v2325_v42, %v2783_v29 }
  0xed   : > { %v658_v45 = vpop.f32.mrf.mxu0 }
  0xee   : > { %850 = vst.msk [vmem:[#allocation2 + $0x30] sm:$0xff] %vm801_vm1, %v770_v43  ;;  %v775_v46 = vmax.f32 %v667_v44, 0.0  ;;  %v659_v47 = vadd.f32 %v2783_v29, %v658_v45 }
  0xef   : > { %v2326_v48 = vpop.f32.mrf.mxu0 }
  0xf0   : > { %855 = vst.msk [vmem:[#allocation2 + $0x88] sm:$0xff] %vm801_vm1, %v775_v46  ;;  %v773_v49 = vmax.f32 %v659_v47, 0.0  ;;  %v670_v50 = vadd.f32 %v2326_v48, %v2783_v29 }
  0xf1   : > { %v661_v51 = vpop.f32.mrf.mxu0 }
  0xf2   : > { %853 = vst.msk [vmem:[#allocation2 + $0x68] sm:$0xff] %vm801_vm1, %v773_v49  ;;  %v776_v52 = vmax.f32 %v670_v50, 0.0  ;;  %v662_v53 = vadd.f32 %v2783_v29, %v661_v51 }
  0xf3   : > { %v998_v54 = vld [vmem:[#allocation2 + $0x49] ss:$2 sm:$0xff]  ;;  %v917_v55 = vld [vmem:[#allocation2 + $0x48] ss:$2 sm:$0xff]  ;;  %v2329_v56 = vpop.f32.mrf.mxu0 }
  0xf4   : > { %856 = vst.msk [vmem:[#allocation2 + $0x90] sm:$0xff] %vm801_vm1, %v776_v52  ;;  %v774_v57 = vmax.f32 %v662_v53, 0.0  ;;  %v2227_v58 = vpack.c.bf16 %v998_v54, %v998_v54  ;;  %v2219_v59 = vpack.c.bf16 %v917_v55, %v917_v55  ;;  %v1321_v60 = vld [vmem:[#allocation2 + $0x47] ss:$2 sm:$0xff]  ;;  %v683_v61 = vadd.f32 %v2329_v56, %v2783_v29  ;;  %v1402_v9 = vld [vmem:[#allocation2 + $0x48] ss:$2 sm:$0xff] }
  0xf5   : > { %v674_v62 = vpop.f32.mrf.mxu0  ;;  %v884_v0 = vld [vmem:[#allocation2 + $0x47] ss:$2 sm:$0xff]  ;;  %v2258_v6 = vpack.c.bf16 %v1321_v60, %v1321_v60  ;;  %v2266_v15 = vpack.c.bf16 %v1402_v9, %v1402_v9  ;;  %v1158_v40 = vld [vmem:[#allocation2 + $0x28] ss:$2 sm:$0xff] }
  0xf6   : > { %854 = vst.msk [vmem:[#allocation2 + $0x70] sm:$0xff] %vm801_vm1, %v774_v57  ;;  %1045 = vrot.lane.b32.xlu1 %v2227_v58, %s3146_s12  ;;  %964 = vrot.lane.b32.xlu0 %v2219_v59, %s2508_s30  ;;  %v675_v63 = vadd.f32 %v2783_v29, %v674_v62  ;;  %v779_v3 = vmax.f32 %v683_v61, 0.0  ;;  %v898_v5 = vpack.c.bf16 %v884_v0, %v884_v0  ;;  %v1483_v18 = vld [vmem:[#allocation2 + $0x49] ss:$2 sm:$0xff] }
  0xf7   : > { %v2330_v4 = vpop.f32.mrf.mxu0  ;;  %v2274_v25 = vpack.c.bf16 %v1483_v18, %v1483_v18  ;;  %v1077_v31 = vld [vmem:[#allocation2 + $0x27] ss:$2 sm:$0xff]  ;;  %v2242_v49 = vpack.c.bf16 %v1158_v40, %v1158_v40 }
  0xf8   : > { %v777_v7 = vmax.f32 %v675_v63, 0.0  ;;  %v686_v8 = vadd.f32 %v2330_v4, %v2783_v29  ;;  %859 = vst.msk [vmem:[#allocation2 + $0xc8] sm:$0xff] %vm801_vm1, %v779_v3  ;;  %v2234_v37 = vpack.c.bf16 %v1077_v31, %v1077_v31  ;;  %v1239_v53 = vld [vmem:[#allocation2 + $0x29] ss:$2 sm:$0xff] }
  0xf9   : > { %v677_v10 = vpop.f32.mrf.mxu0  ;;  %907 = vst.msk [vmem:[#allocation3 + $0x4] sm:$0xf] %vm905_vm3, %v898_v5  ;;  %v2250_v59 = vpack.c.bf16 %v1239_v53, %v1239_v53 }
  0xfa   : > { %1368 = vrot.lane.b32.xlu0 %v2258_v6, %s3140_s15  ;;  %857 = vst.msk [vmem:[#allocation2 + $0xa8] sm:$0xff] %vm801_vm1, %v777_v7  ;;  %v780_v11 = vmax.f32 %v686_v8, 0.0  ;;  %v678_v12 = vadd.f32 %v2783_v29, %v677_v10 }
  0xfb   : > { %v919_v13 = vld [vmem:[#allocation2 + $0x88] ss:$2 sm:$0xff]  ;;  %v2333_v14 = vpop.f32.mrf.mxu0  ;;  %v1323_v19 = vld [vmem:[#allocation2 + $0x87] ss:$2 sm:$0xff] }
  0xfc   : > { %v2220_v16 = vpack.c.bf16 %v919_v13, %v919_v13  ;;  %860 = vst.msk [vmem:[#allocation2 + $0xd0] sm:$0xff] %vm801_vm1, %v780_v11  ;;  %v778_v17 = vmax.f32 %v678_v12, 0.0  ;;  %v699_v20 = vadd.f32 %v2333_v14, %v2783_v29  ;;  %v886_v1 = vld [vmem:[#allocation2 + $0x87] ss:$2 sm:$0xff]  ;;  %v2259_v26 = vpack.c.bf16 %v1323_v19, %v1323_v19  ;;  %v1404_v30 = vld [vmem:[#allocation2 + $0x88] ss:$2 sm:$0xff] }
  0xfd   : > { %v690_v21 = vpop.f32.mrf.mxu0  ;;  %v899_v24 = vpack.c.bf16 %v886_v1, %v886_v1  ;;  %v2267_v36 = vpack.c.bf16 %v1404_v30, %v1404_v30  ;;  %v1485_v39 = vld [vmem:[#allocation2 + $0x89] ss:$2 sm:$0xff]  ;;  %v1160_v62 = vld [vmem:[#allocation2 + $0x68] ss:$2 sm:$0xff] }
  0xfe   : > { %1449 = vrot.lane.b32.xlu0 %v2266_v15, %s3144_s16  ;;  %966 = vrot.lane.b32.xlu1 %v2220_v16, %s2508_s30  ;;  %858 = vst.msk [vmem:[#allocation2 + $0xb0] sm:$0xff] %vm801_vm1, %v778_v17  ;;  %v691_v22 = vadd.f32 %v2783_v29, %v690_v21  ;;  %v783_v23 = vmax.f32 %v699_v20, 0.0  ;;  %v2275_v48 = vpack.c.bf16 %v1485_v39, %v1485_v39  ;;  %v1079_v52 = vld [vmem:[#allocation2 + $0x67] ss:$2 sm:$0xff] }
  0xff   : > { %v2334_v2 = vpop.f32.mrf.mxu0  ;;  %908 = vst.msk [vmem:[#allocation3 + $0x8] sm:$0xf] %vm905_vm3, %v899_v24  ;;  %v2235_v58 = vpack.c.bf16 %v1079_v52, %v1079_v52  ;;  %v1000_v63 = vld [vmem:[#allocation2 + $0x89] ss:$2 sm:$0xff]  ;;  %v2243_v9 = vpack.c.bf16 %v1160_v62, %v1160_v62 }
 0x100   : > { %v781_v27 = vmax.f32 %v691_v22, 0.0  ;;  %v702_v28 = vadd.f32 %v2334_v2, %v2783_v29  ;;  %863 = vst.msk [vmem:[#allocation2 + $0x108] sm:$0xff] %vm801_vm1, %v783_v23  ;;  %v2228_v10 = vpack.c.bf16 %v1000_v63, %v1000_v63  ;;  %v1241_v13 = vld [vmem:[#allocation2 + $0x69] ss:$2 sm:$0xff] }
 0x101   : > { %v693_v32 = vpop.f32.mrf.mxu0  ;;  %v2251_v19 = vpack.c.bf16 %v1241_v13, %v1241_v13 }
 0x102   : > { %1530 = vrot.lane.b32.xlu0 %v2274_v25, %s3142_s22  ;;  %1370 = vrot.lane.b32.xlu1 %v2259_v26, %s3140_s15  ;;  %861 = vst.msk [vmem:[#allocation2 + $0xe8] sm:$0xff] %vm801_vm1, %v781_v27  ;;  %v784_v33 = vmax.f32 %v702_v28, 0.0  ;;  %v694_v34 = vadd.f32 %v2783_v29, %v693_v32 }
 0x103   : > { %v2337_v35 = vpop.f32.mrf.mxu0  ;;  %v888_v44 = vld [vmem:[#allocation2 + $0xc7] ss:$2 sm:$0xff]  ;;  %v921_v21 = vld [vmem:[#allocation2 + $0xc8] ss:$2 sm:$0xff] }
 0x104   : > { %864 = vst.msk [vmem:[#allocation2 + $0x110] sm:$0xff] %vm801_vm1, %v784_v33  ;;  %v782_v38 = vmax.f32 %v694_v34, 0.0  ;;  %v715_v41 = vadd.f32 %v2337_v35, %v2783_v29  ;;  %v900_v47 = vpack.c.bf16 %v888_v44, %v888_v44  ;;  %v1325_v6 = vld [vmem:[#allocation2 + $0xc7] ss:$2 sm:$0xff]  ;;  %v1406_v22 = vld [vmem:[#allocation2 + $0xc8] ss:$2 sm:$0xff]  ;;  %v2221_v28 = vpack.c.bf16 %v921_v21, %v921_v21 }
 0x105   : > { %v706_v42 = vpop.f32.mrf.mxu0  ;;  %v2260_v15 = vpack.c.bf16 %v1325_v6, %v1325_v6  ;;  %v2268_v30 = vpack.c.bf16 %v1406_v22, %v1406_v22  ;;  %v1002_v33 = vld [vmem:[#allocation2 + $0xc9] ss:$2 sm:$0xff] }
 0x106   : > { %1451 = vrot.lane.b32.xlu1 %v2267_v36, %s3144_s16  ;;  %1124 = vrot.lane.b32.xlu0 %v2234_v37, %s2513_s25  ;;  %862 = vst.msk [vmem:[#allocation2 + $0xf0] sm:$0xff] %vm801_vm1, %v782_v38  ;;  %v707_v43 = vadd.f32 %v2783_v29, %v706_v42  ;;  %v787_v45 = vmax.f32 %v715_v41, 0.0  ;;  %v1487_v34 = vld [vmem:[#allocation2 + $0xc9] ss:$2 sm:$0xff]  ;;  %v2229_v39 = vpack.c.bf16 %v1002_v33, %v1002_v33 }
 0x107   : > { %v2338_v46 = vpop.f32.mrf.mxu0  ;;  %909 = vst.msk [vmem:[#allocation3 + $0xc] sm:$0xf] %vm905_vm3, %v900_v47  ;;  %v2276_v40 = vpack.c.bf16 %v1487_v34, %v1487_v34  ;;  %v1081_v44 = vld [vmem:[#allocation2 + $0xa7] ss:$2 sm:$0xff] }
 0x108   : > { %v785_v50 = vmax.f32 %v707_v43, 0.0  ;;  %v718_v51 = vadd.f32 %v2338_v46, %v2783_v29  ;;  %867 = vst.msk [vmem:[#allocation2 + $0x148] sm:$0xff] %vm801_vm1, %v787_v45  ;;  %v2236_v52 = vpack.c.bf16 %v1081_v44, %v1081_v44 }
 0x109   : > { %v709_v54 = vpop.f32.mrf.mxu0 }
 0x10a   : > { %1532 = vrot.lane.b32.xlu1 %v2275_v48, %s3142_s22  ;;  %1205 = vrot.lane.b32.xlu0 %v2242_v49, %s2514_s29  ;;  %865 = vst.msk [vmem:[#allocation2 + $0x128] sm:$0xff] %vm801_vm1, %v785_v50  ;;  %v788_v55 = vmax.f32 %v718_v51, 0.0  ;;  %v710_v56 = vadd.f32 %v2783_v29, %v709_v54 }
 0x10b   : > { %v2341_v57 = vpop.f32.mrf.mxu0  ;;  %v890_v5 = vld [vmem:[#allocation2 + $0x107] ss:$2 sm:$0xff] }
 0x10c   : > { %868 = vst.msk [vmem:[#allocation2 + $0x150] sm:$0xff] %vm801_vm1, %v788_v55  ;;  %v786_v60 = vmax.f32 %v710_v56, 0.0  ;;  %v731_v61 = vadd.f32 %v2341_v57, %v2783_v29  ;;  %v901_v8 = vpack.c.bf16 %v890_v5, %v890_v5  ;;  %v1327_v43 = vld [vmem:[#allocation2 + $0x107] ss:$2 sm:$0xff]  ;;  %v1408_v55 = vld [vmem:[#allocation2 + $0x108] ss:$2 sm:$0xff] }
 0x10d   : > { %v722_v0 = vpop.f32.mrf.mxu0  ;;  %v2261_v51 = vpack.c.bf16 %v1327_v43, %v1327_v43  ;;  %v1162_v56 = vld [vmem:[#allocation2 + $0xa8] ss:$2 sm:$0xff]  ;;  %v1489_v63 = vld [vmem:[#allocation2 + $0x109] ss:$2 sm:$0xff] }
 0x10e   : > { %1126 = vrot.lane.b32.xlu1 %v2235_v58, %s2513_s25  ;;  %1286 = vrot.lane.b32.xlu0 %v2250_v59, %s2515_s13  ;;  %866 = vst.msk [vmem:[#allocation2 + $0x130] sm:$0xff] %vm801_vm1, %v786_v60  ;;  %v791_v3 = vmax.f32 %v731_v61, 0.0  ;;  %v723_v4 = vadd.f32 %v2783_v29, %v722_v0  ;;  %v2269_v60 = vpack.c.bf16 %v1408_v55, %v1408_v55  ;;  %v1243_v0 = vld [vmem:[#allocation2 + $0xa9] ss:$2 sm:$0xff] }
 0x10f   : > { %v2342_v7 = vpop.f32.mrf.mxu0  ;;  %910 = vst.msk [vmem:[#allocation3 + $0x10] sm:$0xf] %vm905_vm3, %v901_v8  ;;  %v2244_v61 = vpack.c.bf16 %v1162_v56, %v1162_v56  ;;  %v2277_v5 = vpack.c.bf16 %v1489_v63, %v1489_v63  ;;  %v2252_v6 = vpack.c.bf16 %v1243_v0, %v1243_v0  ;;  %v923_v8 = vld [vmem:[#allocation2 + $0x108] ss:$2 sm:$0xff] }
 0x110   : > { %871 = vst.msk [vmem:[#allocation2 + $0x188] sm:$0xff] %vm801_vm1, %v791_v3  ;;  %v789_v11 = vmax.f32 %v723_v4, 0.0  ;;  %v734_v12 = vadd.f32 %v2342_v7, %v2783_v29  ;;  %v1083_v7 = vld [vmem:[#allocation2 + $0xe7] ss:$2 sm:$0xff] }
 0x111   : > { %v725_v14 = vpop.f32.mrf.mxu0 }
 0x112   : > { %1207 = vrot.lane.b32.xlu1 %v2243_v9, %s2514_s29  ;;  %1047 = vrot.lane.b32.xlu0 %v2228_v10, %s3146_s12  ;;  %869 = vst.msk [vmem:[#allocation2 + $0x168] sm:$0xff] %vm801_vm1, %v789_v11  ;;  %v792_v16 = vmax.f32 %v734_v12, 0.0  ;;  %v726_v17 = vadd.f32 %v2783_v29, %v725_v14  ;;  %v2237_v9 = vpack.c.bf16 %v1083_v7, %v1083_v7  ;;  %v1164_v11 = vld [vmem:[#allocation2 + $0xe8] ss:$2 sm:$0xff]  ;;  %v1004_v12 = vld [vmem:[#allocation2 + $0x109] ss:$2 sm:$0xff] }
 0x113   : > { %v2345_v18 = vpop.f32.mrf.mxu0  ;;  %v892_v24 = vld [vmem:[#allocation2 + $0x147] ss:$2 sm:$0xff]  ;;  %v2222_v10 = vpack.c.bf16 %v923_v8, %v923_v8  ;;  %v925_v22 = vld [vmem:[#allocation2 + $0x148] ss:$2 sm:$0xff] }
 0x114   : > { %872 = vst.msk [vmem:[#allocation2 + $0x190] sm:$0xff] %vm801_vm1, %v792_v16  ;;  %v790_v20 = vmax.f32 %v726_v17, 0.0  ;;  %v747_v1 = vadd.f32 %v2345_v18, %v2783_v29  ;;  %v902_v27 = vpack.c.bf16 %v892_v24, %v892_v24  ;;  %v2439_v14 = vld [vmem:[%s3133_s5 + $0x8] sm:$0xff]   ;;  %v2245_v16 = vpack.c.bf16 %v1164_v11, %v1164_v11 }
 0x115   : > { %v738_v23 = vpop.f32.mrf.mxu0  ;;  %v2230_v17 = vpack.c.bf16 %v1004_v12, %v1004_v12  ;;  %v1245_v18 = vld [vmem:[#allocation2 + $0xe9] ss:$2 sm:$0xff]  ;;  %v1166_v34 = vld [vmem:[#allocation2 + $0x128] ss:$2 sm:$0xff] }
 0x116   : > { %1288 = vrot.lane.b32.xlu1 %v2251_v19, %s2515_s13  ;;  %1372 = vrot.lane.b32.xlu0 %v2260_v15, %s3140_s15  ;;  %870 = vst.msk [vmem:[#allocation2 + $0x170] sm:$0xff] %vm801_vm1, %v790_v20  ;;  %v739_v2 = vadd.f32 %v2783_v29, %v738_v23  ;;  %v795_v25 = vmax.f32 %v747_v1, 0.0  ;;  %v1329_v15 = vld [vmem:[#allocation2 + $0x147] ss:$2 sm:$0xff]  ;;  %v2253_v21 = vpack.c.bf16 %v1245_v18, %v1245_v18  ;;  %v1410_v1 = vld [vmem:[#allocation2 + $0x148] ss:$2 sm:$0xff] }
 0x117   : > { %v2346_v26 = vpop.f32.mrf.mxu0  ;;  %911 = vst.msk [vmem:[#allocation3 + $0x14] sm:$0xf] %vm905_vm3, %v902_v27  ;;  %v2440_v19 = vld [vmem:[%s3133_s5] sm:$0xff]   ;;  %v2262_v20 = vpack.c.bf16 %v1329_v15, %v1329_v15  ;;  %v2223_v23 = vpack.c.bf16 %v925_v22, %v925_v22  ;;  %v1006_v24 = vld [vmem:[#allocation2 + $0x149] ss:$2 sm:$0xff] }
 0x118   : > { %v793_v31 = vmax.f32 %v739_v2, 0.0  ;;  %v750_v32 = vadd.f32 %v2346_v26, %v2783_v29  ;;  %875 = vst.msk [vmem:[#allocation2 + $0x1c8] sm:$0xff] %vm801_vm1, %v795_v25  ;;  %v2270_v2 = vpack.c.bf16 %v1410_v1, %v1410_v1  ;;  %v1491_v25 = vld [vmem:[#allocation2 + $0x149] ss:$2 sm:$0xff]  ;;  %v2231_v26 = vpack.c.bf16 %v1006_v24, %v1006_v24 }
 0x119   : > { %v741_v35 = vpop.f32.mrf.mxu0  ;;  %v2278_v27 = vpack.c.bf16 %v1491_v25, %v1491_v25 }
 0x11a   : > { %968 = vrot.lane.b32.xlu1 %v2221_v28, %s2508_s30  ;;  %1453 = vrot.lane.b32.xlu0 %v2268_v30, %s3144_s16  ;;  %873 = vst.msk [vmem:[#allocation2 + $0x1a8] sm:$0xff] %vm801_vm1, %v793_v31  ;;  %v796_v36 = vmax.f32 %v750_v32, 0.0  ;;  %v742_v37 = vadd.f32 %v2783_v29, %v741_v35  ;;  %v1085_v30 = vld [vmem:[#allocation2 + $0x127] ss:$2 sm:$0xff] }
 0x11b   : > { %v2349_v38 = vpop.f32.mrf.mxu0  ;;  %v894_v48 = vld [vmem:[#allocation2 + $0x187] ss:$2 sm:$0xff]  ;;  %v2238_v32 = vpack.c.bf16 %v1085_v30, %v1085_v30  ;;  %v1412_v33 = vld [vmem:[#allocation2 + $0x188] ss:$2 sm:$0xff] }
 0x11c   : > { %876 = vst.msk [vmem:[#allocation2 + $0x1d0] sm:$0xff] %vm801_vm1, %v796_v36  ;;  %v794_v41 = vmax.f32 %v742_v37, 0.0  ;;  %v763_v42 = vadd.f32 %v2349_v38, %v2783_v29  ;;  %v903_v50 = vpack.c.bf16 %v894_v48, %v894_v48  ;;  %v1331_v28 = vld [vmem:[#allocation2 + $0x187] ss:$2 sm:$0xff]  ;;  %v2271_v35 = vpack.c.bf16 %v1412_v33, %v1412_v33 }
 0x11d   : > { %v754_v45 = vpop.f32.mrf.mxu0  ;;  %v2263_v31 = vpack.c.bf16 %v1331_v28, %v1331_v28  ;;  %v2246_v36 = vpack.c.bf16 %v1166_v34, %v1166_v34  ;;  %v1493_v37 = vld [vmem:[#allocation2 + $0x189] ss:$2 sm:$0xff] }
 0x11e   : > { %1049 = vrot.lane.b32.xlu1 %v2229_v39, %s3146_s12  ;;  %1534 = vrot.lane.b32.xlu0 %v2276_v40, %s3142_s22  ;;  %874 = vst.msk [vmem:[#allocation2 + $0x1b0] sm:$0xff] %vm801_vm1, %v794_v41  ;;  %v799_v46 = vmax.f32 %v763_v42, 0.0  ;;  %v755_v47 = vadd.f32 %v2783_v29, %v754_v45  ;;  %v1247_v38 = vld [vmem:[#allocation2 + $0x129] ss:$2 sm:$0xff]  ;;  %v2279_v39 = vpack.c.bf16 %v1493_v37, %v1493_v37  ;;  %v927_v42 = vld [vmem:[#allocation2 + $0x188] ss:$2 sm:$0xff] }
 0x11f   : > { %v2350_v49 = vpop.f32.mrf.mxu0  ;;  %912 = vst.msk [vmem:[#allocation3 + $0x18] sm:$0xf] %vm905_vm3, %v903_v50  ;;  %v2254_v40 = vpack.c.bf16 %v1247_v38, %v1247_v38  ;;  %v1087_v41 = vld [vmem:[#allocation2 + $0x167] ss:$2 sm:$0xff]  ;;  %v2224_v44 = vpack.c.bf16 %v927_v42, %v927_v42  ;;  %v1168_v45 = vld [vmem:[#allocation2 + $0x168] ss:$2 sm:$0xff] }
 0x120   : > { %879 = vst.msk [vmem:[#allocation2 + $0x208] sm:$0xff] %vm801_vm1, %v799_v46  ;;  %v797_v53 = vmax.f32 %v755_v47, 0.0  ;;  %v766_v54 = vadd.f32 %v2350_v49, %v2783_v29  ;;  %v2239_v43 = vpack.c.bf16 %v1087_v41, %v1087_v41  ;;  %v1008_v46 = vld [vmem:[#allocation2 + $0x189] ss:$2 sm:$0xff]  ;;  %v2247_v48 = vpack.c.bf16 %v1168_v45, %v1168_v45 }
 0x121   : > { %v757_v57 = vpop.f32.mrf.mxu0  ;;  %v2232_v49 = vpack.c.bf16 %v1008_v46, %v1008_v46  ;;  %v1249_v50 = vld [vmem:[#allocation2 + $0x169] ss:$2 sm:$0xff] }
 0x122   : > { %1374 = vrot.lane.b32.xlu1 %v2261_v51, %s3140_s15  ;;  %1128 = vrot.lane.b32.xlu0 %v2236_v52, %s2513_s25  ;;  %877 = vst.msk [vmem:[#allocation2 + $0x1e8] sm:$0xff] %vm801_vm1, %v797_v53  ;;  %v800_v58 = vmax.f32 %v766_v54, 0.0  ;;  %v758_v59 = vadd.f32 %v2783_v29, %v757_v57  ;;  %v2438_v29 = vld [vmem:[%s3133_s5 + $0x10] ss:$0 sps:$4 sm:$0x33]   ;;  %s3153_s15 = smov 32   ;;  %v2255_v52 = vpack.c.bf16 %v1249_v50, %v1249_v50 }
 0x123   : > { %v896_v3 = vld [vmem:[#allocation2 + $0x1c7] ss:$2 sm:$0xff]  ;;  %2385 = vmatprep.subr.msk.bf16.mxu1 %vm1631_vm6, %v2438_v29  ;;  %v1633_v13 = vsel %vm1631_vm6, %v2438_v29, 0  ;;  %v929_v53 = vld [vmem:[#allocation2 + $0x1c8] ss:$2 sm:$0xff] }
 0x124   : > { %880 = vst.msk [vmem:[#allocation2 + $0x210] sm:$0xff] %vm801_vm1, %v800_v58  ;;  %v798_v62 = vmax.f32 %v758_v59, 0.0  ;;  %v904_v4 = vpack.c.bf16 %v896_v3, %v896_v3  ;;  %2352 = vmatpush3.bf16.msra.mxu1 %v1633_v13  ;;  %v1333_v47 = vld [vmem:[#allocation2 + $0x1c7] ss:$2 sm:$0xff]  ;;  %v1414_v54 = vld [vmem:[#allocation2 + $0x1c8] ss:$2 sm:$0xff]  ;;  %v2225_v55 = vpack.c.bf16 %v929_v53, %v929_v53 }
 0x125   : > { %2353 = vmatprep.subr.bf16.mxu1 %v2439_v14  ;;  %v2264_v51 = vpack.c.bf16 %v1333_v47, %v1333_v47  ;;  %v2272_v56 = vpack.c.bf16 %v1414_v54, %v1414_v54  ;;  %v1010_v57 = vld [vmem:[#allocation2 + $0x1c9] ss:$2 sm:$0xff] }
 0x126   : > { %1455 = vrot.lane.b32.xlu1 %v2269_v60, %s3144_s16  ;;  %1209 = vrot.lane.b32.xlu0 %v2244_v61, %s2514_s29  ;;  %878 = vst.msk [vmem:[#allocation2 + $0x1f0] sm:$0xff] %vm801_vm1, %v798_v62  ;;  %s3151_s16 = smov 24   ;;  %v1089_v58 = vld [vmem:[#allocation2 + $0x1a7] ss:$2 sm:$0xff]  ;;  %v2233_v59 = vpack.c.bf16 %v1010_v57, %v1010_v57  ;;  %v1170_v62 = vld [vmem:[#allocation2 + $0x1a8] ss:$2 sm:$0xff] }
 0x127   : > { %913 = vst.msk [vmem:[#allocation3 + $0x1c] sm:$0xf] %vm905_vm3, %v904_v4  ;;  %v2240_v60 = vpack.c.bf16 %v1089_v58, %v1089_v58  ;;  %v2248_v0 = vpack.c.bf16 %v1170_v62, %v1170_v62  ;;  %v1251_v4 = vld [vmem:[#allocation2 + $0x1a9] ss:$2 sm:$0xff] }
 0x128   : > { %2354 = vmatpush3.bf16.msra.mxu1 %v2439_v14  ;;  %v1495_v8 = vld [vmem:[#allocation2 + $0x1c9] ss:$2 sm:$0xff] }
 0x129   : > { %2355 = vmatprep.subr.bf16.mxu1 %v2440_v19  ;;  %v2280_v11 = vpack.c.bf16 %v1495_v8, %v1495_v8 }
 0x12a   : > { %1536 = vrot.lane.b32.xlu1 %v2277_v5, %s3142_s22  ;;  %1290 = vrot.lane.b32.xlu0 %v2252_v6, %s2515_s13  ;;  %s3152_s22 = smov 28   ;;  %v2256_v6 = vpack.c.bf16 %v1251_v4, %v1251_v4 }
 0x12b   : > { %v1335_v61 = vld [vmem:[#allocation2 + $0x207] ss:$2 sm:$0xff]  ;;  %v1416_v3 = vld [vmem:[#allocation2 + $0x208] ss:$2 sm:$0xff] }
 0x12c   : > { %2356 = vmatpush3.bf16.msra.mxu1 %v2440_v19  ;;  %v2265_v63 = vpack.c.bf16 %v1335_v61, %v1335_v61  ;;  %v2273_v5 = vpack.c.bf16 %v1416_v3, %v1416_v3  ;;  %v1497_v19 = vld [vmem:[#allocation2 + $0x209] ss:$2 sm:$0xff] }
 0x12d   : > { %v1091_v7 = vld [vmem:[#allocation2 + $0x1e7] ss:$2 sm:$0xff]  ;;  %v1172_v12 = vld [vmem:[#allocation2 + $0x1e8] ss:$2 sm:$0xff]  ;;  %v2281_v22 = vpack.c.bf16 %v1497_v19, %v1497_v19 }
 0x12e   : > { %1130 = vrot.lane.b32.xlu1 %v2237_v9, %s2513_s25  ;;  %970 = vrot.lane.b32.xlu0 %v2222_v10, %s2508_s30  ;;  %v2241_v10 = vpack.c.bf16 %v1091_v7, %v1091_v7  ;;  %v2249_v14 = vpack.c.bf16 %v1172_v12, %v1172_v12  ;;  %v1253_v15 = vld [vmem:[#allocation2 + $0x1e9] ss:$2 sm:$0xff] }
 0x12f   : > { %v2257_v18 = vpack.c.bf16 %v1253_v15, %v1253_v15 }
 0x132   : > { %1211 = vrot.lane.b32.xlu1 %v2245_v16, %s2514_s29  ;;  %1051 = vrot.lane.b32.xlu0 %v2230_v17, %s3146_s12 }
 0x136   : > { %1292 = vrot.lane.b32.xlu1 %v2253_v21, %s2515_s13  ;;  %1376 = vrot.lane.b32.xlu0 %v2262_v20, %s3151_s16 }
 0x13a   : > { %972 = vrot.lane.b32.xlu1 %v2223_v23, %s2508_s30  ;;  %1457 = vrot.lane.b32.xlu0 %v2270_v2, %s3152_s22 }
 0x13e   : > { %1053 = vrot.lane.b32.xlu1 %v2231_v26, %s3146_s12  ;;  %1538 = vrot.lane.b32.xlu0 %v2278_v27, %s3153_s15 }
 0x142   : > { %1378 = vrot.lane.b32.xlu1 %v2263_v31, %s3151_s16  ;;  %1132 = vrot.lane.b32.xlu0 %v2238_v32, %s2513_s25 }
 0x146   : > { %1459 = vrot.lane.b32.xlu1 %v2271_v35, %s3152_s22  ;;  %1213 = vrot.lane.b32.xlu0 %v2246_v36, %s2514_s29 }
 0x14a   : > { %1540 = vrot.lane.b32.xlu1 %v2279_v39, %s3153_s15  ;;  %1294 = vrot.lane.b32.xlu0 %v2254_v40, %s2515_s13 }
 0x14e   : > { %1134 = vrot.lane.b32.xlu1 %v2239_v43, %s2513_s25  ;;  %974 = vrot.lane.b32.xlu0 %v2224_v44, %s2508_s30 }
 0x152   : > { %1215 = vrot.lane.b32.xlu1 %v2247_v48, %s2514_s29  ;;  %1055 = vrot.lane.b32.xlu0 %v2232_v49, %s3146_s12 }
 0x156   : > { %1296 = vrot.lane.b32.xlu1 %v2255_v52, %s2515_s13  ;;  %1380 = vrot.lane.b32.xlu0 %v2264_v51, %s3151_s16 }
 0x15a   : > { %976 = vrot.lane.b32.xlu1 %v2225_v55, %s2508_s30  ;;  %1461 = vrot.lane.b32.xlu0 %v2272_v56, %s3152_s22 }
 0x15e   : > { %1057 = vrot.lane.b32.xlu1 %v2233_v59, %s3146_s12  ;;  %1136 = vrot.lane.b32.xlu0 %v2240_v60, %s2513_s25 }
 0x162   : > { %1382 = vrot.lane.b32.xlu1 %v2265_v63, %s3151_s16  ;;  %1217 = vrot.lane.b32.xlu0 %v2248_v0, %s2514_s29 }
 0x166   : > { %1463 = vrot.lane.b32.xlu1 %v2273_v5, %s3152_s22  ;;  %1298 = vrot.lane.b32.xlu0 %v2256_v6, %s2515_s13  ;;  %s377_s22 = sand.u32 1, %s2497_s18  }
 0x167   : > { %s3087_s21 = scalar_lea.sflag [#allocation5], %s377_s22 }
 0x168   : > { %v1046_v29 = vpop.permute.xlu1 %1045  ;;  %v965_v9 = vpop.permute.xlu0 %964 }
 0x169   : > { %988 = vst.msk [vmem:[#allocation3 + $0x4] sm:$0xf] %vm986_vm4, %v965_v9 }
 0x16a   : > { %1069 = vst.msk [vmem:[#allocation3 + $0x4] sm:$0xf] %vm1067_vm5, %v1046_v29  ;;  %1138 = vrot.lane.b32.xlu1 %v2241_v10, %s2513_s25  ;;  %1542 = vrot.lane.b32.xlu0 %v2280_v11, %s3153_s15  ;;  %s2095_s25 = sshll.u32 %s377_s22, 6 }
 0x16c   : > { %v1369_v13 = vpop.permute.xlu0 %1368 }
 0x16e   : > { %1219 = vrot.lane.b32.xlu1 %v2249_v14, %s2514_s29  ;;  %s3031_s29 = scalar_lea.vmem [#allocation4], %s2095_s25  ;;  %s3077_s25 = scalar_lea.hbm %s3139_s11, %s2282_s14 }
 0x16f   : > { %s1981_s16 = sshll.u32 %s3031_s29, 4  ;;  %s3081_s16 = int_to_ptr.vmem [resolvable:$true] %s1981_s16 }
 0x170   : > { %v1450_v16 = vpop.permute.xlu0 %1449  ;;  %v967_v17 = vpop.permute.xlu1 %966 }
 0x171   : > { %989 = vst.msk [vmem:[#allocation3 + $0x8] sm:$0xf] %vm986_vm4, %v967_v17 }
 0x172   : > { %1300 = vrot.lane.b32.xlu1 %v2257_v18, %s2515_s13  ;;  %v1712_v18 = vld [vmem:[%s3135_s7] sm:$0x3]  ;;  %s2516_s13 = smov [#allocation4]  }
 0x173   : > { %2386 = vmatprep.subr.msk.bf16.mxu1 %vm1631_vm6, %v1712_v18  ;;  %v1733_v19 = vsel %vm1631_vm6, %v1712_v18, 0  ;;  %s2449_s14 = sshll.u32 %s2516_s13, 4  ;;  %s2450_s14 = int_to_ptr.vmem [resolvable:$false] %s2449_s14 }
 0x174   : > { %v1531_v20 = vpop.permute.xlu0 %1530  ;;  %v1371_v21 = vpop.permute.xlu1 %1370  ;;  %p2452_p0 = scmp.lt.s32.totalorder %s3081_s16, %s2450_s14 }
 0x176   : > { %1544 = vrot.lane.b32.xlu1 %v2281_v22, %s3153_s15  ;;  %s2451_s15 = scalar_lea.vmem %s2450_s14, 2048 }
 0x178   : > { %v1452_v1 = vpop.permute.xlu1 %1451  ;;  %v1125_v23 = vpop.permute.xlu0 %1124 }
 0x179   : > { %1149 = vst.msk [vmem:[#allocation3] sm:$0xf] %vm1148_vm7, %v1125_v23 }
 0x17c   : > { %v1533_v2 = vpop.permute.xlu1 %1532  ;;  %v1206_v24 = vpop.permute.xlu0 %1205 }
 0x17d   : > { %1230 = vst.msk [vmem:[#allocation3] sm:$0xf] %vm1229_vm8, %v1206_v24 }
 0x180   : > { %v1127_v25 = vpop.permute.xlu1 %1126  ;;  %v1287_v26 = vpop.permute.xlu0 %1286 }
 0x181   : > { %1150 = vst.msk [vmem:[#allocation3 + $0x4] sm:$0xf] %vm1148_vm7, %v1127_v25 }
 0x182   : > { %1311 = vst.msk [vmem:[#allocation3] sm:$0xf] %vm1310_vm9, %v1287_v26 }
 0x183   : > { %1393 = vst.msk [vmem:[#allocation3] sm:$0xf] %vm1392_vm10, %v1369_v13 }
 0x184   : > { %1474 = vst.msk [vmem:[#allocation3] sm:$0xf] %vm1473_vm11, %v1450_v16  ;;  %v1208_v27 = vpop.permute.xlu1 %1207  ;;  %v1048_v28 = vpop.permute.xlu0 %1047 }
 0x185   : > { %1555 = vst.msk [vmem:[#allocation3] sm:$0xf] %vm1554_vm12, %v1531_v20  ;;  %v2444_v20 = vld [vmem:[%s3137_s9] sm:$0xff]  }
 0x186   : > { %1231 = vst.msk [vmem:[#allocation3 + $0x4] sm:$0xf] %vm1229_vm8, %v1208_v27 }
 0x187   : > { %1070 = vst.msk [vmem:[#allocation3 + $0x8] sm:$0xf] %vm1067_vm5, %v1048_v28 }
 0x188   : > { %v1289_v30 = vpop.permute.xlu1 %1288  ;;  %v1373_v31 = vpop.permute.xlu0 %1372 }
 0x189   : > { %1312 = vst.msk [vmem:[#allocation3 + $0x4] sm:$0xf] %vm1310_vm9, %v1289_v30 }
 0x18a   : > { %1394 = vst.msk [vmem:[#allocation3 + $0x4] sm:$0xf] %vm1392_vm10, %v1371_v21 }
 0x18b   : > { %1475 = vst.msk [vmem:[#allocation3 + $0x4] sm:$0xf] %vm1473_vm11, %v1452_v1  ;;  %v2182_v1 = vld [vmem:[%s3134_s6] ss:$0 sm:$0xff] }
 0x18c   : > { %1556 = vst.msk [vmem:[#allocation3 + $0x4] sm:$0xf] %vm1554_vm12, %v1533_v2  ;;  %v969_v32 = vpop.permute.xlu1 %968  ;;  %v1454_v33 = vpop.permute.xlu0 %1453 }
 0x18d   : > { %990 = vst.msk [vmem:[#allocation3 + $0xc] sm:$0xf] %vm986_vm4, %v969_v32 }
 0x190   : > { %v1050_v34 = vpop.permute.xlu1 %1049  ;;  %v1535_v35 = vpop.permute.xlu0 %1534 }
 0x191   : > { %1071 = vst.msk [vmem:[#allocation3 + $0xc] sm:$0xf] %vm1067_vm5, %v1050_v34 }
 0x193   : > { %v2437_v36 = vld [vmem:[#allocation3] sm:$0xff]  }
 0x194   : > { %v1375_v37 = vpop.permute.xlu1 %1374  ;;  %v1129_v38 = vpop.permute.xlu0 %1128  ;;  %2357 = vmatprep.mubr.msk.bf16.mxu1 %vm1618_vm13, %v2437_v36 }
 0x195   : > { %1151 = vst.msk [vmem:[#allocation3 + $0x8] sm:$0xf] %vm1148_vm7, %v1129_v38 }
 0x198   : > { %v1456_v39 = vpop.permute.xlu1 %1455  ;;  %v1210_v40 = vpop.permute.xlu0 %1209 }
 0x199   : > { %1232 = vst.msk [vmem:[#allocation3 + $0x8] sm:$0xf] %vm1229_vm8, %v1210_v40 }
 0x19c   : > { %v1537_v41 = vpop.permute.xlu1 %1536  ;;  %v1291_v42 = vpop.permute.xlu0 %1290 }
 0x19d   : > { %1313 = vst.msk [vmem:[#allocation3 + $0x8] sm:$0xf] %vm1310_vm9, %v1291_v42 }
 0x19e   : > { %1395 = vst.msk [vmem:[#allocation3 + $0x8] sm:$0xf] %vm1392_vm10, %v1373_v31 }
 0x19f   : > { %1476 = vst.msk [vmem:[#allocation3 + $0x8] sm:$0xf] %vm1473_vm11, %v1454_v33 }
 0x1a0   : > { %1557 = vst.msk [vmem:[#allocation3 + $0x8] sm:$0xf] %vm1554_vm12, %v1535_v35  ;;  %v1131_v43 = vpop.permute.xlu1 %1130  ;;  %v971_v44 = vpop.permute.xlu0 %970 }
 0x1a1   : > { %1152 = vst.msk [vmem:[#allocation3 + $0xc] sm:$0xf] %vm1148_vm7, %v1131_v43 }
 0x1a2   : > { %991 = vst.msk [vmem:[#allocation3 + $0x10] sm:$0xf] %vm986_vm4, %v971_v44  ;;  %v1816_v44 = vld [vmem:[%s2639_s24] ss:$2 sm:$0xff] }
 0x1a4   : > { %v1212_v45 = vpop.permute.xlu1 %1211  ;;  %v1052_v46 = vpop.permute.xlu0 %1051 }
 0x1a5   : > { %1233 = vst.msk [vmem:[#allocation3 + $0xc] sm:$0xf] %vm1229_vm8, %v1212_v45  ;;  %v2199_v45 = vld [vmem:[%s2639_s24 + $0x20] ss:$2 sm:$0xff] }
 0x1a6   : > { %1072 = vst.msk [vmem:[#allocation3 + $0x10] sm:$0xf] %vm1067_vm5, %v1052_v46 }
 0x1a8   : > { %v1293_v47 = vpop.permute.xlu1 %1292  ;;  %v1377_v48 = vpop.permute.xlu0 %1376 }
 0x1a9   : > { %1314 = vst.msk [vmem:[#allocation3 + $0xc] sm:$0xf] %vm1310_vm9, %v1293_v47 }
 0x1aa   : > { %1396 = vst.msk [vmem:[#allocation3 + $0xc] sm:$0xf] %vm1392_vm10, %v1375_v37 }
 0x1ab   : > { %1477 = vst.msk [vmem:[#allocation3 + $0xc] sm:$0xf] %vm1473_vm11, %v1456_v39 }
 0x1ac   : > { %1558 = vst.msk [vmem:[#allocation3 + $0xc] sm:$0xf] %vm1554_vm12, %v1537_v41  ;;  %v973_v49 = vpop.permute.xlu1 %972  ;;  %v1458_v50 = vpop.permute.xlu0 %1457 }
 0x1ad   : > { %992 = vst.msk [vmem:[#allocation3 + $0x14] sm:$0xf] %vm986_vm4, %v973_v49 }
 0x1b0   : > { %v1054_v51 = vpop.permute.xlu1 %1053  ;;  %v1539_v52 = vpop.permute.xlu0 %1538 }
 0x1b1   : > { %1073 = vst.msk [vmem:[#allocation3 + $0x14] sm:$0xf] %vm1067_vm5, %v1054_v51 }
 0x1b3   : > { %v2441_v53 = vld [vmem:[#allocation3 + $0x8] sm:$0xff]  }
 0x1b4   : > { %v1379_v54 = vpop.permute.xlu1 %1378  ;;  %v1133_v55 = vpop.permute.xlu0 %1132  ;;  %2358 = vmatmul.mubr.msk.bf16.vlgmr.msra.gmra.mxu1 %vm1618_vm13, %v2441_v53  ;;  %v2201_v53 = vld [vmem:[%s2639_s24 + $0x60] ss:$2 sm:$0xff] }
 0x1b5   : > { %1153 = vst.msk [vmem:[#allocation3 + $0x10] sm:$0xf] %vm1148_vm7, %v1133_v55  ;;  %2366 = vmatpush3.bf16.msra.mxu1 %v1733_v19  ;;  %v2203_v55 = vld [vmem:[%s2639_s24 + $0xa0] ss:$2 sm:$0xff] }
 0x1b6   : > { %2375 = vmatprep.subr.bf16.mxu1 %v2444_v20 }
 0x1b8   : > { %v1460_v56 = vpop.permute.xlu1 %1459  ;;  %v1214_v57 = vpop.permute.xlu0 %1213 }
 0x1b9   : > { %1234 = vst.msk [vmem:[#allocation3 + $0x10] sm:$0xf] %vm1229_vm8, %v1214_v57 }
 0x1bc   : > { %v1541_v58 = vpop.permute.xlu1 %1540  ;;  %v1295_v59 = vpop.permute.xlu0 %1294 }
 0x1bd   : > { %1315 = vst.msk [vmem:[#allocation3 + $0x10] sm:$0xf] %vm1310_vm9, %v1295_v59  ;;  %v2205_v59 = vld [vmem:[%s2639_s24 + $0xe0] ss:$2 sm:$0xff] }
 0x1be   : > { %1397 = vst.msk [vmem:[#allocation3 + $0x10] sm:$0xf] %vm1392_vm10, %v1377_v48 }
 0x1bf   : > { %1478 = vst.msk [vmem:[#allocation3 + $0x10] sm:$0xf] %vm1473_vm11, %v1458_v50  ;;  %v1831_v50 = vpack.c.bf16 %v2199_v45, %v1816_v44 }
 0x1c0   : > { %1559 = vst.msk [vmem:[#allocation3 + $0x10] sm:$0xf] %vm1554_vm12, %v1539_v52  ;;  %v1135_v60 = vpop.permute.xlu1 %1134  ;;  %v975_v61 = vpop.permute.xlu0 %974  ;;  %v2200_v52 = vld [vmem:[%s2639_s24 + $0x40] ss:$2 sm:$0xff] }
 0x1c1   : > { %1154 = vst.msk [vmem:[#allocation3 + $0x14] sm:$0xf] %vm1148_vm7, %v1135_v60 }
 0x1c2   : > { %993 = vst.msk [vmem:[#allocation3 + $0x18] sm:$0xf] %vm986_vm4, %v975_v61  ;;  %v2194_v61 = vld [vmem:[%s3136_s8] ss:$0 sm:$0xff] }
 0x1c4   : > { %v1216_v62 = vpop.permute.xlu1 %1215  ;;  %v1056_v63 = vpop.permute.xlu0 %1055 }
 0x1c5   : > { %1235 = vst.msk [vmem:[#allocation3 + $0x14] sm:$0xf] %vm1229_vm8, %v1216_v62 }
 0x1c6   : > { %1074 = vst.msk [vmem:[#allocation3 + $0x18] sm:$0xf] %vm1067_vm5, %v1056_v63 }
 0x1c8   : > { %v1297_v0 = vpop.permute.xlu1 %1296  ;;  %v1381_v3 = vpop.permute.xlu0 %1380 }
 0x1c9   : > { %1316 = vst.msk [vmem:[#allocation3 + $0x14] sm:$0xf] %vm1310_vm9, %v1297_v0 }
 0x1ca   : > { %1398 = vst.msk [vmem:[#allocation3 + $0x14] sm:$0xf] %vm1392_vm10, %v1379_v54  ;;  %v2202_v54 = vld [vmem:[%s2639_s24 + $0x80] ss:$2 sm:$0xff] }
 0x1cb   : > { %1479 = vst.msk [vmem:[#allocation3 + $0x14] sm:$0xf] %vm1473_vm11, %v1460_v56  ;;  %v1832_v56 = vpack.c.bf16 %v2201_v53, %v2200_v52  ;;  %v1833_v57 = vpack.c.bf16 %v2203_v55, %v2202_v54 }
 0x1cc   : > { %1560 = vst.msk [vmem:[#allocation3 + $0x14] sm:$0xf] %vm1554_vm12, %v1541_v58  ;;  %v977_v4 = vpop.permute.xlu1 %976  ;;  %v1462_v5 = vpop.permute.xlu0 %1461  ;;  %v2204_v58 = vld [vmem:[%s2639_s24 + $0xc0] ss:$2 sm:$0xff]  ;;  %s2445_s24 = scalar_lea.vmem %s3081_s16, 1024 }
 0x1cd   : > { %994 = vst.msk [vmem:[#allocation3 + $0x1c] sm:$0xf] %vm986_vm4, %v977_v4  ;;  %v1834_v60 = vpack.c.bf16 %v2205_v59, %v2204_v58  ;;  %p2446_p11 = scmp.ne.s32.totalorder %s3081_s16, %s2445_s24  ;;  %p2453_p1 = scmp.lt.s32.totalorder %s2451_s15, %s2445_s24 }
 0x1cf   : > { %p2447_p12 = pnand %p2446_p11, %p2616_p5  ;;  %p2454_p2 = por %p2453_p1, %p2452_p0 }
 0x1d0   : > { %v1058_v6 = vpop.permute.xlu1 %1057  ;;  %v1137_v7 = vpop.permute.xlu0 %1136 }
 0x1d1   : > { %1075 = vst.msk [vmem:[#allocation3 + $0x1c] sm:$0xf] %vm1067_vm5, %v1058_v6  ;;  %p2448_p13 = pneg %p2447_p12 }
 0x1d2   : > { %1155 = vst.msk [vmem:[#allocation3 + $0x18] sm:$0xf] %vm1148_vm7, %v1137_v7 }
 0x1d3   : > { %v2442_v8 = vld [vmem:[#allocation3 + $0x10] sm:$0xff]   ;;  %p2455_p3 = pnand %p2454_p2, %p2448_p13 }
 0x1d4   : > { %v1383_v29 = vpop.permute.xlu1 %1382  ;;  %v1218_v9 = vpop.permute.xlu0 %1217  ;;  %2361 = vmatprep.mubr.msk.bf16.mxu1 %vm1618_vm13, %v2442_v8 }
 0x1d5   : > { %1236 = vst.msk [vmem:[#allocation3 + $0x18] sm:$0xf] %vm1229_vm8, %v1218_v9 }
 0x1d8   : > { %v1464_v10 = vpop.permute.xlu1 %1463  ;;  %v1299_v11 = vpop.permute.xlu0 %1298 }
 0x1d9   : > { %1317 = vst.msk [vmem:[#allocation3 + $0x18] sm:$0xf] %vm1310_vm9, %v1299_v11 }
 0x1da   : > { %1399 = vst.msk [vmem:[#allocation3 + $0x18] sm:$0xf] %vm1392_vm10, %v1381_v3 }
 0x1db   : > { %1480 = vst.msk [vmem:[#allocation3 + $0x18] sm:$0xf] %vm1473_vm11, %v1462_v5 }
 0x1dc   : > { %v1139_v12 = vpop.permute.xlu1 %1138  ;;  %v1543_v13 = vpop.permute.xlu0 %1542 }
 0x1dd   : > { %1156 = vst.msk [vmem:[#allocation3 + $0x1c] sm:$0xf] %vm1148_vm7, %v1139_v12 }
 0x1de   : > { %1561 = vst.msk [vmem:[#allocation3 + $0x18] sm:$0xf] %vm1554_vm12, %v1543_v13 }
 0x1e0   : > { %v1220_v14 = vpop.permute.xlu1 %1219 }
 0x1e1   : > { %1237 = vst.msk [vmem:[#allocation3 + $0x1c] sm:$0xf] %vm1229_vm8, %v1220_v14 }
 0x1e4   : > { %v1301_v15 = vpop.permute.xlu1 %1300 }
 0x1e5   : > { %1318 = vst.msk [vmem:[#allocation3 + $0x1c] sm:$0xf] %vm1310_vm9, %v1301_v15 }
 0x1e6   : > { %1400 = vst.msk [vmem:[#allocation3 + $0x1c] sm:$0xf] %vm1392_vm10, %v1383_v29 }
 0x1e7   : > { %1481 = vst.msk [vmem:[#allocation3 + $0x1c] sm:$0xf] %vm1473_vm11, %v1464_v10 }
 0x1e8   : > { %v1545_v16 = vpop.permute.xlu1 %1544 }
 0x1e9   : > { %1562 = vst.msk [vmem:[#allocation3 + $0x1c] sm:$0xf] %vm1554_vm12, %v1545_v16 }
 0x1f0   : > { %v2443_v17 = vld [vmem:[#allocation3 + $0x18] sm:$0xff]  }
 0x1f1   : > { %2362 = vmatmul.mubr.msk.bf16.gmra.mxu1 %vm1618_vm13, %v2443_v17 }
 0x274   : > { %v2359_v21 = vpop.f32.mrf.mxu1 }
 0x275   : > { %v1678_v25 = vadd.f32 %v2359_v21, %v2182_v1 }
 0x276   : > { %v1669_v22 = vpop.f32.mrf.mxu1 }
 0x277   : > { %v1670_v2 = vadd.f32 %v2182_v1, %v1669_v22  ;;  %v1702_v32 = vmax.f32 %v1678_v25, 0.0 }
 0x278   : > { %v2360_v23 = vpop.f32.mrf.mxu1 }
 0x279   : > { %v1681_v24 = vadd.f32 %v2360_v23, %v2182_v1  ;;  %v1700_v30 = vmax.f32 %v1670_v2, 0.0 }
 0x27a   : > { %v1672_v26 = vpop.f32.mrf.mxu1 }
 0x27b   : > { %v1673_v27 = vadd.f32 %v2182_v1, %v1672_v26  ;;  %v1703_v28 = vmax.f32 %v1681_v24, 0.0 }
 0x27d   : > { %v1701_v31 = vmax.f32 %v1673_v27, 0.0  ;;  %v1709_v34 = vpack.c.bf16 %v1703_v28, %v1702_v32 }
 0x27f   : > { %v1708_v33 = vpack.c.bf16 %v1701_v31, %v1700_v30 }
 0x281   : > { %2367 = vmatprep.mubr.msk.bf16.mxu1 %vm801_vm1, %v1708_v33 }
 0x282   : > { %2368 = vmatmul.mubr.msk.bf16.vlgmr.msra.gmra.mxu1 %vm801_vm1, %v1709_v34 }
 0x283   : > { %2376 = vmatpush3.bf16.msra.mxu1 %v2444_v20  ;;  %v2206_v20 = vld [vmem:[%s3138_s10] ss:$0 sm:$0xff] }
 0x2b1   : > { %v2363_v35 = vpop.f32.mrf.mxu1 }
 0x2b2   : > { %v1694_v40 = vadd.f32 %v2363_v35, %v2182_v1 }
 0x2b3   : > { %v1685_v36 = vpop.f32.mrf.mxu1 }
 0x2b4   : > { %v1686_v38 = vadd.f32 %v2182_v1, %v1685_v36  ;;  %v1706_v48 = vmax.f32 %v1694_v40, 0.0 }
 0x2b5   : > { %v2364_v37 = vpop.f32.mrf.mxu1 }
 0x2b6   : > { %v1697_v39 = vadd.f32 %v2364_v37, %v2182_v1  ;;  %v1704_v46 = vmax.f32 %v1686_v38, 0.0 }
 0x2b7   : > { %v1688_v41 = vpop.f32.mrf.mxu1 }
 0x2b8   : > { %v1689_v42 = vadd.f32 %v2182_v1, %v1688_v41  ;;  %v1707_v43 = vmax.f32 %v1697_v39, 0.0 }
 0x2ba   : > { %v1705_v47 = vmax.f32 %v1689_v42, 0.0  ;;  %v1711_v51 = vpack.c.bf16 %v1707_v43, %v1706_v48 }
 0x2bc   : > { %v1710_v49 = vpack.c.bf16 %v1705_v47, %v1704_v46 }
 0x2be   : > { %2371 = vmatprep.mubr.msk.bf16.mxu1 %vm801_vm1, %v1710_v49 }
 0x2bf   : > { %2372 = vmatmul.mubr.msk.bf16.gmra.mxu1 %vm801_vm1, %v1711_v51 }
 0x2c0   : > { %2377 = vmatprep.mubr.msk.bf16.mxu1 %vm559_vm0, %v1831_v50 }
 0x2c7   : > { %2378 = vmatmul.mubr.msk.bf16.vlgmr.msra.gmra.mxu1 %vm559_vm0, %v1832_v56 }
 0x2c8   : > { %2381 = vmatprep.mubr.msk.bf16.mxu1 %vm559_vm0, %v1833_v57 }
 0x2cf   : > { %2382 = vmatmul.mubr.msk.bf16.gmra.mxu1 %vm559_vm0, %v1834_v60 }
 0x342   : > { %v2369_v62 = vpop.f32.mrf.mxu1 }
 0x343   : > { %v1778_v63 = vadd.f32 %v2369_v62, %v2194_v61 }
 0x344   : > { %v1769_v0 = vpop.f32.mrf.mxu1 }
 0x345   : > { %v1802_v3 = vmax.f32 %v1778_v63, 0.0  ;;  %v1770_v4 = vadd.f32 %v2194_v61, %v1769_v0 }
 0x346   : > { %v2370_v5 = vpop.f32.mrf.mxu1 }
 0x347   : > { %1810 = vst.msk [vmem:[%s3031_s29 + $0x10] sm:$0xff] %vm559_vm0, %v1802_v3  ;;  %v1800_v6 = vmax.f32 %v1770_v4, 0.0  ;;  %v1781_v7 = vadd.f32 %v2370_v5, %v2194_v61 }
 0x348   : > { %v1772_v8 = vpop.f32.mrf.mxu1 }
 0x349   : > { %1808 = vst.msk [vmem:[%s3031_s29] sm:$0xff] %vm559_vm0, %v1800_v6  ;;  %v1803_v29 = vmax.f32 %v1781_v7, 0.0  ;;  %v1773_v9 = vadd.f32 %v2194_v61, %v1772_v8 }
 0x34b   : > { %1811 = vst.msk [vmem:[%s3031_s29 + $0x18] sm:$0xff] %vm559_vm0, %v1803_v29  ;;  %v1801_v10 = vmax.f32 %v1773_v9, 0.0 }
 0x34d   : > { %1809 = vst.msk [vmem:[%s3031_s29 + $0x8] sm:$0xff] %vm559_vm0, %v1801_v10 }
 0x34e   : > { %v1937_v27 = vld [vmem:[%s3031_s29 + $0x10] sm:$0xff] }
 0x350   : > { %v1935_v33 = vld [vmem:[%s3031_s29] sm:$0xff] }
 0x352   : > { %v1938_v39 = vld [vmem:[%s3031_s29 + $0x18] sm:$0xff] }
 0x354   : > { %v1936_v45 = vld [vmem:[%s3031_s29 + $0x8] sm:$0xff] }
 0x37f   : > { %v2373_v11 = vpop.f32.mrf.mxu1 }
 0x380   : > { %v1794_v12 = vadd.f32 %v2373_v11, %v2194_v61 }
 0x381   : > { %v1785_v13 = vpop.f32.mrf.mxu1 }
 0x382   : > { %v1806_v14 = vmax.f32 %v1794_v12, 0.0  ;;  %v1786_v15 = vadd.f32 %v2194_v61, %v1785_v13 }
 0x383   : > { %v2374_v16 = vpop.f32.mrf.mxu1 }
 0x384   : > { %1814 = vst.msk [vmem:[%s3031_s29 + $0x30] sm:$0xff] %vm559_vm0, %v1806_v14  ;;  %v1804_v17 = vmax.f32 %v1786_v15, 0.0  ;;  %v1797_v18 = vadd.f32 %v2374_v16, %v2194_v61 }
 0x385   : > { %v1788_v19 = vpop.f32.mrf.mxu1 }
 0x386   : > { %1812 = vst.msk [vmem:[%s3031_s29 + $0x20] sm:$0xff] %vm559_vm0, %v1804_v17  ;;  %v1807_v21 = vmax.f32 %v1797_v18, 0.0  ;;  %v1789_v22 = vadd.f32 %v2194_v61, %v1788_v19 }
 0x387   : > { %v2379_v1 = vpop.f32.mrf.mxu1 }
 0x388   : > { %1815 = vst.msk [vmem:[%s3031_s29 + $0x38] sm:$0xff] %vm559_vm0, %v1807_v21  ;;  %v1805_v23 = vmax.f32 %v1789_v22, 0.0  ;;  %v1905_v2 = vadd.f32 %v2379_v1, %v2206_v20 }
 0x389   : > { %v1896_v24 = vpop.f32.mrf.mxu1 }
 0x38a   : > { %1813 = vst.msk [vmem:[%s3031_s29 + $0x28] sm:$0xff] %vm559_vm0, %v1805_v23  ;;  %v1929_v25 = vmax.f32 %v1905_v2, 0.0  ;;  %v1897_v26 = vadd.f32 %v2206_v20, %v1896_v24 }
 0x38b   : > { %v2380_v28 = vpop.f32.mrf.mxu1  ;;  %v1941_v51 = vld [vmem:[%s3031_s29 + $0x30] sm:$0xff] }
 0x38c   : > { %v1945_v30 = vadd.f32 %v1937_v27, %v1929_v25  ;;  %v1927_v31 = vmax.f32 %v1897_v26, 0.0  ;;  %v1908_v32 = vadd.f32 %v2380_v28, %v2206_v20 }
 0x38d   : > { %v1899_v34 = vpop.f32.mrf.mxu1  ;;  %v1939_v57 = vld [vmem:[%s3031_s29 + $0x20] sm:$0xff] }
 0x38e   : > { %v1953_v35 = vmax.f32 %v1945_v30, 0.0  ;;  %v1943_v36 = vadd.f32 %v1935_v33, %v1927_v31  ;;  %v1930_v37 = vmax.f32 %v1908_v32, 0.0  ;;  %v1900_v38 = vadd.f32 %v2206_v20, %v1899_v34 }
 0x38f   : > { %v2383_v40 = vpop.f32.mrf.mxu1  ;;  %v1942_v63 = vld [vmem:[%s3031_s29 + $0x38] sm:$0xff] }
 0x390   : > { %1961 = vst.msk [vmem:[%s3031_s29 + $0x10] sm:$0xff] %vm559_vm0, %v1953_v35  ;;  %v1951_v41 = vmax.f32 %v1943_v36, 0.0  ;;  %v1946_v42 = vadd.f32 %v1938_v39, %v1930_v37  ;;  %v1928_v43 = vmax.f32 %v1900_v38, 0.0  ;;  %v1921_v44 = vadd.f32 %v2383_v40, %v2206_v20 }
 0x391   : > { %v1912_v46 = vpop.f32.mrf.mxu1  ;;  %v1940_v5 = vld [vmem:[%s3031_s29 + $0x28] sm:$0xff] }
 0x392   : > { %1959 = vst.msk [vmem:[%s3031_s29] sm:$0xff] %vm559_vm0, %v1951_v41  ;;  %v1954_v47 = vmax.f32 %v1946_v42, 0.0  ;;  %v1944_v48 = vadd.f32 %v1936_v45, %v1928_v43  ;;  %v1933_v49 = vmax.f32 %v1921_v44, 0.0  ;;  %v1913_v50 = vadd.f32 %v2206_v20, %v1912_v46 }
 0x393   : > { %v2384_v52 = vpop.f32.mrf.mxu1 }
 0x394   : > { %1962 = vst.msk [vmem:[%s3031_s29 + $0x18] sm:$0xff] %vm559_vm0, %v1954_v47  ;;  %v1952_v53 = vmax.f32 %v1944_v48, 0.0  ;;  %v1949_v54 = vadd.f32 %v1941_v51, %v1933_v49  ;;  %v1931_v55 = vmax.f32 %v1913_v50, 0.0  ;;  %v1924_v56 = vadd.f32 %v2384_v52, %v2206_v20 }
 0x395   : > { %v1915_v58 = vpop.f32.mrf.mxu1 }
 0x396   : > { %1960 = vst.msk [vmem:[%s3031_s29 + $0x8] sm:$0xff] %vm559_vm0, %v1952_v53  ;;  %v1957_v59 = vmax.f32 %v1949_v54, 0.0  ;;  %v1947_v60 = vadd.f32 %v1939_v57, %v1931_v55  ;;  %v1934_v61 = vmax.f32 %v1924_v56, 0.0  ;;  %v1916_v62 = vadd.f32 %v2206_v20, %v1915_v58 }
 0x398   : > { %1965 = vst.msk [vmem:[%s3031_s29 + $0x30] sm:$0xff] %vm559_vm0, %v1957_v59  ;;  %v1955_v0 = vmax.f32 %v1947_v60, 0.0  ;;  %v1950_v3 = vadd.f32 %v1942_v63, %v1934_v61  ;;  %v1932_v4 = vmax.f32 %v1916_v62, 0.0 }
 0x39a   : > { %1963 = vst.msk [vmem:[%s3031_s29 + $0x20] sm:$0xff] %vm559_vm0, %v1955_v0  ;;  %v1958_v6 = vmax.f32 %v1950_v3, 0.0  ;;  %v1948_v7 = vadd.f32 %v1940_v5, %v1932_v4 }
 0x39c   : > { %1966 = vst.msk [vmem:[%s3031_s29 + $0x38] sm:$0xff] %vm559_vm0, %v1958_v6  ;;  %v1956_v8 = vmax.f32 %v1948_v7, 0.0 }
 0x39e   : > { %1964 = vst.msk [vmem:[%s3031_s29 + $0x28] sm:$0xff] %vm559_vm0, %v1956_v8 }
 0x39f   : > { %2458 = shalt.err (!%p2455_p3)
}
 0x3a0   : > { %s2459_s22 = scalar_lea.hbm %s3077_s25, 1024  ;;  %s2463_s13 = scalar_lea.hbm %s3139_s11, 2048 }
 0x3a1   : > { %p2460_p4 = scmp.ne.s32.totalorder %s3077_s25, %s2459_s22  ;;  %p2464_p9 = scmp.lt.s32.totalorder %s3077_s25, %s3139_s11 }
 0x3a2   : > { %p2465_p10 = scmp.lt.s32.totalorder %s2463_s13, %s2459_s22 }
 0x3a3   : > { %p2461_p7 = pnand %p2460_p4, %p2616_p5 }
 0x3a4   : > { %p2466_p11 = por %p2465_p10, %p2464_p9 }
 0x3a5   : > { %p2462_p8 = pneg %p2461_p7 }
 0x3a7   : > { %p2467_p12 = pnand %p2466_p11, %p2462_p8 }
 0x3a9   : > { %2470 = shalt.err (!%p2467_p12)
}
 0x3aa   : > { %s2517_s24 = smov 128   ;;  %s3154_s14 = smov 8  }
 0x3ab   : > { %2387 = dma.vmem_to_hbm [thread:$0]  (%p2616_p5), %s3081_s16, 1024, %s3077_s25, %s3087_s21, %s2517_s24, %s2517_s24, %s3154_s14  }
 0x3ac PF: > { %p2393_p13 = scmp.ge.s32.totalorder %s2505_s20, 2  ;;  %s1996_s15 = sand.u32 1, %s2493_s17  }
 0x3ad   : > { %s1997_s0 = scalar_lea.sflag [#allocation5], %s1996_s15 }
 0x3ae   : > { %p2390_p0 = pnand %p2393_p13, %p2620_p6 }
 0x3b0   : > { %p2391_p1 = pneg %p2390_p0 }
 0x3b2   : > { %2488 = dma.done.wait (%p2391_p1), %s1997_s0, 1024  }
 0x3b3   : > { %2490 = vsyncadd (%p2391_p1), %s1997_s0, 4294966272  ;;  %p21_p2 = scmp.ge.s32.totalorder %s2603_s23, 4   ;;  %s3155_s17 = smov %s2497_s18 }
 0x3b4   : > { %s3156_s18 = smov %s2501_s19  ;;  %s3157_s19 = smov %s2614_s26 }
 0x3b5   : > { %s3158_s20 = smov %s2603_s23  ;;  %23 = sbr.rel (!%p21_p2) target bundleno = 5 (0x5), region = 181 }
 0x3ba   :  { %2002 = vsyncpa [#allocation5], 1 }
 0x3bb   :  { %2004 = vsyncpa [#allocation5 + $0x1], 1 }

</bundles_post_ra>
